<compile_context>
chip_gen: v6e
topology: v6e:2x2x1
jax: 0.10.0
libtpu: 0.0.40
codegen_flags: <defaults>
</compile_context>

<pallas_src>
import jax
import jax.numpy as jnp
from jax.experimental import pallas as pl
from jax.experimental.pallas import tpu as pltpu


# ---------------- Constants (stand-in for Model.Const) ----------------
class Const:
    node_count = 4
    tcn_hidden_channels = 8
    tcn_layer = 2
    expected_time_cell_num = 8   # == seq_len of the encoder inputs


HIDDEN = 32          # UniVariateSeq2Seq GRU hidden size
ENC_IN_FEATS = 2     # per-node feature channels
PRED_LEN = 4         # decoder (target) length
LEAKY_SLOPE = 0.01

SEQ_T = Const.expected_time_cell_num        # 8
CH = Const.tcn_hidden_channels              # 8
TC = SEQ_T * CH                             # 64  (time x conv channels)
NL = Const.tcn_layer                        # 2
FEAT = ENC_IN_FEATS                         # 2
H = HIDDEN                                  # 32
G = 3 * H                                   # 96  stacked GRU gate width
P = PRED_LEN                                # 4
LANE = 128                                  # lane / padded-gate stride
CTX = 2 * NL * SEQ_T                        # 32  context feature size

assert FEAT == 2
assert TC <= LANE and G <= LANE and P <= LANE


def _align8(n):
    return ((n + 7) // 8) * 8


def _alloc_rows(segs):
    offs, o = {}, 0
    for name, rows in segs:
        offs[name] = o
        o += _align8(rows)
    return offs, o


# ---- packed weight slab 1 (width 128, all row offsets sublane-aligned) ----
W1_OFF, W1_ROWS = _alloc_rows([
    ("A0", SEQ_T),       # banded conv layer 0 (time reversal + K=2 fold baked in)
    ("B1", LANE),        # banded conv layer 1 (64x64 padded to 128x128)
    ("WC_L0C0", LANE),   # ctx weights = (channel-sum S) @ dec_wi_ctx slice
    ("WC_L0C1", LANE),
    ("WC_L1C0", LANE),
    ("WC_L1C1", LANE),
    ("EWH", H),          # encoder GRU recurrent weights (r|z|n stacked, padded)
    ("DWH", H),          # decoder GRU recurrent weights
    ("WOUT", P * H),     # block-diag output head over stacked decoder states
    ("BIAS", 8),         # rows: b0, b1, enc_bh, dec_bi(ctx), dec_bh, out_b
])

# ---- packed weight slab 2: structured per-step input projections ----
W2_OFF, W2_ROWS = _alloc_rows([
    ("WE0", SEQ_T),      # encoder channel-0 projection, one 128-lane block per t
    ("WE1", SEQ_T),      # encoder channel-1 projection
    ("EBI", 1),          # encoder input bias tiled per t
    ("WT", P),           # decoder target projection, one 128-lane block per step
])
W2_COLS = max(SEQ_T, P) * LANE


def _leaky(v):
    return jnp.where(v > 0, v, LEAKY_SLOPE * v)


# =====================================================================
# Fused kernel: TCN (banded matmuls) + folded context projection + GRU
# encoder/decoder (batched over B, input projections hoisted) + linear head.
# =====================================================================
def fused_kernel(idx_ref, x_ref, tgt_ref, w1_ref, w2_ref, out_ref):
    # idx_ref : scalar-prefetched node index; the node gather is already done
    #           by the BlockSpec index_maps, so it is unused in the body.
    # x_ref   : (Bb, FEAT, SEQ_T) selected node, original time order
    # tgt_ref : (Bb, P) teacher-forcing targets
    # w1_ref  : (W1_ROWS, 128) packed weights/biases
    # w2_ref  : (W2_ROWS, W2_COLS) structured per-step input projections
    # out_ref : (Bb, P)
    del idx_ref
    f32 = jnp.float32

    def dot(a, b):
        return jnp.dot(a, b, preferred_element_type=f32)

    def w1(name, rows):
        o = W1_OFF[name]
        return w1_ref[o:o + rows, :]

    xv = x_ref[...]                        # (Bb, 2, SEQ_T)
    x0 = xv[:, 0, :]                       # (Bb, SEQ_T) channel 0
    x1 = xv[:, 1, :]                       # (Bb, SEQ_T) channel 1

    bias = w1("BIAS", 8)                   # (8, 128)
    b0, b1 = bias[0:1, :], bias[1:2, :]
    enc_bh, dec_cb = bias[2:3, :], bias[3:4, :]
    dec_bh, out_b = bias[4:5, :], bias[5:6, :]

    # --- TCN: two causal-conv layers as banded matmuls, per input channel ---
    a0 = w1("A0", SEQ_T)                   # (SEQ_T, 128)
    bm1 = w1("B1", LANE)                   # (128, 128)
    h0c0 = _leaky(dot(x0, a0) + b0)        # (Bb, 128) layer-0 features, ch 0
    h0c1 = _leaky(dot(x1, a0) + b0)
    h1c0 = _leaky(dot(h0c0, bm1) + b1)     # layer-1 features
    h1c1 = _leaky(dot(h0c1, bm1) + b1)

    # --- context path folded into the decoder input projection:
    #     ctx @ Wi_ctx + dec_bi == sum_{layer,chan} h_{l,c} @ (S @ Wi_ctx slice)
    ctx_gi = (dot(h0c0, w1("WC_L0C0", LANE)) + dot(h0c1, w1("WC_L0C1", LANE))
              + dot(h1c0, w1("WC_L1C0", LANE)) + dot(h1c1, w1("WC_L1C1", LANE))
              + dec_cb)                    # (Bb, 128)

    # --- encoder input projections hoisted off the serial recurrence ---
    we0 = w2_ref[W2_OFF["WE0"]:W2_OFF["WE0"] + SEQ_T, :]
    we1 = w2_ref[W2_OFF["WE1"]:W2_OFF["WE1"] + SEQ_T, :]
    ebi = w2_ref[W2_OFF["EBI"]:W2_OFF["EBI"] + 1, :]
    enc_gx = dot(x0, we0) + dot(x1, we1) + ebi          # (Bb, SEQ_T*128)

    enc_wh = w1("EWH", H)                  # (32, 128)
    dec_wh = w1("DWH", H)

    def gru_step(gi, h, wh, bh):
        gh = dot(h, wh) + bh               # (Bb, 128): only serial-path matmul
        r = jax.nn.sigmoid(gi[:, 0:H] + gh[:, 0:H])
        z = jax.nn.sigmoid(gi[:, H:2 * H] + gh[:, H:2 * H])
        n = jnp.tanh(gi[:, 2 * H:3 * H] + r * gh[:, 2 * H:3 * H])
        return (1.0 - z) * n + z * h

    # --- GRU encoder (M = Bb rows per step) ---
    h = jnp.zeros((x_ref.shape[0], H), dtype=f32)
    for t in range(SEQ_T):
        h = gru_step(enc_gx[:, t * LANE:(t + 1) * LANE], h, enc_wh, enc_bh)

    # --- GRU decoder (teacher forcing); target projection hoisted too ---
    wt = w2_ref[W2_OFF["WT"]:W2_OFF["WT"] + P, 0:P * LANE]
    dec_tx = dot(tgt_ref[...], wt)                      # (Bb, P*128)
    hs = []
    for p in range(P):
        h = gru_step(dec_tx[:, p * LANE:(p + 1) * LANE] + ctx_gi,
                     h, dec_wh, dec_bh)
        hs.append(h)

    # --- linear head applied once to all decoder states (block-diag weights) ---
    hcat = jnp.concatenate(hs, axis=1)                  # (Bb, P*H = 128)
    y = dot(hcat, w1("WOUT", P * H)) + out_b            # (Bb, 128)
    out_ref[...] = y[:, 0:P]


# ---------------- weight preparation (trace-time folding) ----------------
def _band_matrix(w, T):
    """Causal conv taps (K, cin, cout) -> banded matmul matrix (T*cin, T*cout)."""
    K, cin, cout = w.shape
    t_in = jnp.arange(T)[:, None]
    t_out = jnp.arange(T)[None, :]
    dt = t_out - t_in
    taps = w[jnp.clip(dt, 0, K - 1)]                      # (T, T, cin, cout)
    taps = jnp.where(((dt >= 0) & (dt < K))[:, :, None, None], taps, 0.0)
    return taps.transpose(0, 2, 1, 3).reshape(T * cin, T * cout)


def _stack_gates(w):                                      # (3, a, b) -> (a, 3b)
    return jnp.concatenate([w[0], w[1], w[2]], axis=-1)


def prepare_kernel_params(params):
    f32 = jnp.float32

    # fold K=2 conv into K=3 (linear), band-matrix both layers, and bake the
    # encoder's time reversal into layer-0's band (row reversal)
    w3_0 = params["tcn_w3_0"].at[0:2].add(params["tcn_w2_0"])      # (3, 1, CH)
    w3_1 = params["tcn_w3_1"].at[0:2].add(params["tcn_w2_1"])      # (3, CH, CH)
    A0 = _band_matrix(w3_0, SEQ_T)[::-1, :]                        # (SEQ_T, TC)
    B1 = _band_matrix(w3_1, SEQ_T)                                 # (TC, TC)
    b0 = jnp.tile(params["tcn_b_0"].reshape(1, CH), (1, SEQ_T))    # (1, TC)
    b1 = jnp.tile(params["tcn_b_1"].reshape(1, CH), (1, SEQ_T))
    S = jnp.kron(jnp.eye(SEQ_T, dtype=f32), jnp.ones((CH, 1), f32))  # (TC, SEQ_T)

    enc_wi = _stack_gates(params["enc_wi"])      # (FEAT, G)
    enc_bi = _stack_gates(params["enc_bi"])      # (1, G)
    enc_wh = _stack_gates(params["enc_wh"])      # (H, G)
    enc_bh = _stack_gates(params["enc_bh"])
    dec_wi = _stack_gates(params["dec_wi"])      # (1 + CTX, G)
    dec_bi = _stack_gates(params["dec_bi"])
    dec_wh = _stack_gates(params["dec_wh"])
    dec_bh = _stack_gates(params["dec_bh"])
    dec_wi_t = dec_wi[0:1]                       # target-feature row (1, G)
    dec_wi_c = dec_wi[1:]                        # context rows (CTX, G)

    # fold channel-sum (S), the (channel, layer, time) flatten, and the decoder
    # context projection into 4 matrices, one per (layer, channel)
    def wc(layer, chan):
        off = chan * NL * SEQ_T + layer * SEQ_T
        return S @ dec_wi_c[off:off + SEQ_T]     # (TC, G)

    # ---------------- slab 1 (width 128) ----------------
    slab1 = jnp.zeros((W1_ROWS, LANE), f32)

    def put(slab, name, mat):
        r, c = mat.shape
        o = W1_OFF[name]
        return slab.at[o:o + r, 0:c].set(mat.astype(f32))

    slab1 = put(slab1, "A0", A0)
    slab1 = put(slab1, "B1", B1)
    slab1 = put(slab1, "WC_L0C0", wc(0, 0))
    slab1 = put(slab1, "WC_L0C1", wc(0, 1))
    slab1 = put(slab1, "WC_L1C0", wc(1, 0))
    slab1 = put(slab1, "WC_L1C1", wc(1, 1))
    slab1 = put(slab1, "EWH", enc_wh)
    slab1 = put(slab1, "DWH", dec_wh)

    wout = jnp.zeros((P * H, P), f32)
    for p in range(P):
        wout = wout.at[p * H:(p + 1) * H, p].set(params["out_w"][:, 0])
    slab1 = put(slab1, "WOUT", wout)

    ob = W1_OFF["BIAS"]
    slab1 = slab1.at[ob + 0, 0:TC].set(b0[0])
    slab1 = slab1.at[ob + 1, 0:TC].set(b1[0])
    slab1 = slab1.at[ob + 2, 0:G].set(enc_bh[0])
    slab1 = slab1.at[ob + 3, 0:G].set(dec_bi[0])
    slab1 = slab1.at[ob + 4, 0:G].set(dec_bh[0])
    slab1 = slab1.at[ob + 5, 0:P].set(jnp.full((P,), params["out_b"][0, 0], f32))

    # ------------- slab 2 (structured per-step input projections) -------------
    slab2 = jnp.zeros((W2_ROWS, W2_COLS), f32)

    def lane_block(vec):                         # (G,) -> (1, LANE) zero padded
        return jnp.zeros((1, LANE), f32).at[0, 0:G].set(vec)

    we0 = jnp.kron(jnp.eye(SEQ_T, dtype=f32), lane_block(enc_wi[0]))
    we1 = jnp.kron(jnp.eye(SEQ_T, dtype=f32), lane_block(enc_wi[1]))
    ebi = jnp.tile(lane_block(enc_bi[0]), (1, SEQ_T))
    wt = jnp.kron(jnp.eye(P, dtype=f32), lane_block(dec_wi_t[0]))

    slab2 = slab2.at[W2_OFF["WE0"]:W2_OFF["WE0"] + SEQ_T, 0:SEQ_T * LANE].set(we0)
    slab2 = slab2.at[W2_OFF["WE1"]:W2_OFF["WE1"] + SEQ_T, 0:SEQ_T * LANE].set(we1)
    slab2 = slab2.at[W2_OFF["EBI"], 0:SEQ_T * LANE].set(ebi[0])
    slab2 = slab2.at[W2_OFF["WT"]:W2_OFF["WT"] + P, 0:P * LANE].set(wt)

    return {"w1": slab1, "w2": slab2}


# ---------------- fused forward (single pallas_call) ----------------
def _forward_impl(kernel_params, inputs, target, index_of_node, *, batch_blocks=1):
    B, N, Fdim, Tdim = inputs.shape
    assert Fdim == FEAT and Tdim == SEQ_T and target.shape == (B, P)
    assert B % batch_blocks == 0
    Bb = B // batch_blocks
    if batch_blocks > 1:
        # v7x: set batch_blocks=2 (B a multiple of 16) to shard batch halves
        # across both TensorCores; keep 1 on v5e/v6e or for small B.
        assert Bb % 8 == 0

    idx = jnp.asarray(index_of_node, jnp.int32).reshape((1,))
    x = inputs.astype(jnp.float32)
    tgt = target.astype(jnp.float32)

    grid_spec = pltpu.PrefetchScalarGridSpec(
        num_scalar_prefetch=1,
        grid=(batch_blocks,),
        in_specs=[
            # selected node gathered at DMA time via the scalar-prefetched index
            pl.BlockSpec((Bb, None, FEAT, SEQ_T),
                         lambda i, idx_ref: (i, idx_ref[0], 0, 0)),
            pl.BlockSpec((Bb, P), lambda i, idx_ref: (i, 0)),
            pl.BlockSpec((W1_ROWS, LANE), lambda i, idx_ref: (0, 0)),
            pl.BlockSpec((W2_ROWS, W2_COLS), lambda i, idx_ref: (0, 0)),
        ],
        out_specs=pl.BlockSpec((Bb, P), lambda i, idx_ref: (i, 0)),
    )

    return pl.pallas_call(
        fused_kernel,
        out_shape=jax.ShapeDtypeStruct((B, P), jnp.float32),
        grid_spec=grid_spec,
        compiler_params=pltpu.CompilerParams(
            dimension_semantics=("parallel",),
        ),
    )(idx, x, tgt, kernel_params["w1"], kernel_params["w2"])


seq2seq_based_model = jax.jit(_forward_impl, static_argnames=("batch_blocks",))


# ---------------- deterministic parameter initialization ----------------
def init_params(key):
    Din = 1 + CTX
    ks = jax.random.split(key, 16)
    s = 0.1
    return {
        "tcn_w2_0": s * jax.random.normal(ks[0], (2, 1, CH), jnp.float32),
        "tcn_w3_0": s * jax.random.normal(ks[1], (3, 1, CH), jnp.float32),
        "tcn_b_0":  s * jax.random.normal(ks[2], (1, 1, CH), jnp.float32),
        "tcn_w2_1": s * jax.random.normal(ks[3], (2, CH, CH), jnp.float32),
        "tcn_w3_1": s * jax.random.normal(ks[4], (3, CH, CH), jnp.float32),
        "tcn_b_1":  s * jax.random.normal(ks[5], (1, 1, CH), jnp.float32),
        "enc_wi": s * jax.random.normal(ks[6], (3, FEAT, H), jnp.float32),
        "enc_wh": s * jax.random.normal(ks[7], (3, H, H), jnp.float32),
        "enc_bi": s * jax.random.normal(ks[8], (3, 1, H), jnp.float32),
        "enc_bh": s * jax.random.normal(ks[9], (3, 1, H), jnp.float32),
        "dec_wi": s * jax.random.normal(ks[10], (3, Din, H), jnp.float32),
        "dec_wh": s * jax.random.normal(ks[11], (3, H, H), jnp.float32),
        "dec_bi": s * jax.random.normal(ks[12], (3, 1, H), jnp.float32),
        "dec_bh": s * jax.random.normal(ks[13], (3, 1, H), jnp.float32),
        "out_w": s * jax.random.normal(ks[14], (H, 1), jnp.float32),
        "out_b": s * jax.random.normal(ks[15], (1, 1), jnp.float32),
    }


# ---------------- pure-JAX reference (un-folded weights) ----------------
def reference_forward(params, inputs, target, index_of_node):
    B, N, F, T = inputs.shape
    L = Const.tcn_layer
    Ch = Const.tcn_hidden_channels
    Hh = HIDDEN
    Pp = target.shape[1]

    x = inputs[:, :, 0:2, ::-1].reshape(B * N * 2, T, 1).astype(jnp.float32)

    def causal_conv(h, w):
        K = w.shape[0]
        out = jnp.zeros(h.shape[:2] + (w.shape[2],), jnp.float32)
        for j in range(K):
            hj = jnp.pad(h, ((0, 0), (j, 0), (0, 0)))[:, :T]
            out = out + jnp.einsum("mti,io->mto", hj, w[j])
        return out

    h0 = _leaky(causal_conv(x, params["tcn_w2_0"]) + causal_conv(x, params["tcn_w3_0"])
                + params["tcn_b_0"].reshape(1, 1, Ch))
    h1 = _leaky(causal_conv(h0, params["tcn_w2_1"]) + causal_conv(h0, params["tcn_w3_1"])
                + params["tcn_b_1"].reshape(1, 1, Ch))
    feat = jnp.stack([h0.sum(-1), h1.sum(-1)], axis=1)          # (M, L, T)
    feat = feat.reshape(B, N, 2, L, T)
    context = feat[:, index_of_node].reshape(B, 2 * L * T)

    enc_x = jnp.swapaxes(inputs[:, index_of_node], -1, -2).astype(jnp.float32)

    def gru_step(xt, h, wi, wh, bi, bh):
        def ix(v, w, b, g):
            return v @ w[g] + b[g]
        r = jax.nn.sigmoid(ix(xt, wi, bi, 0) + ix(h, wh, bh, 0))
        z = jax.nn.sigmoid(ix(xt, wi, bi, 1) + ix(h, wh, bh, 1))
        n = jnp.tanh(ix(xt, wi, bi, 2) + r * ix(h, wh, bh, 2))
        return (1.0 - z) * n + z * h

    h = jnp.zeros((B, Hh), jnp.float32)
    for t in range(T):
        h = gru_step(enc_x[:, t, :], h, params["enc_wi"], params["enc_wh"],
                     params["enc_bi"], params["enc_bh"])
    ys = []
    for p in range(Pp):
        xt = jnp.concatenate([target[:, p:p + 1], context], axis=-1)
        h = gru_step(xt, h, params["dec_wi"], params["dec_wh"],
                     params["dec_bi"], params["dec_bh"])
        ys.append(h @ params["out_w"] + params["out_b"])
    return jnp.concatenate(ys, axis=1)                           # (B, P)


if __name__ == "__main__":
    key = jax.random.PRNGKey(0)
    k_in, k_tgt, k_par = jax.random.split(key, 3)
    B = 2
    inputs = jax.random.normal(
        k_in, (B, Const.node_count, ENC_IN_FEATS, SEQ_T), jnp.float32)
    target = jax.random.normal(k_tgt, (B, PRED_LEN), jnp.float32)
    params = init_params(k_par)
    kparams = prepare_kernel_params(params)   # fold / band / pack weights once
    index_of_node = 1

    out = seq2seq_based_model(kparams, inputs, target, index_of_node)
    out = jax.block_until_ready(out)
    assert out.shape == (B, PRED_LEN)
    assert bool(jnp.all(jnp.isfinite(out)))

    ref = reference_forward(params, inputs, target, index_of_node)
    assert bool(jnp.allclose(out, ref, rtol=1e-3, atol=1e-3)), (out, ref)
    print("KERNEL_OK")
</pallas_src>

<mosaic_0001>
module attributes {stable_mosaic.version = 11 : i64} {
  func.func @fused_kernel(%arg0: i32, %arg1: memref<1xi32, #tpu.memory_space<smem>>, %arg2: memref<2x1x2x8xf32, #tpu.memory_space<vmem>>, %arg3: memref<2x4xf32, #tpu.memory_space<vmem>>, %arg4: memref<848x128xf32, #tpu.memory_space<vmem>>, %arg5: memref<32x1024xf32, #tpu.memory_space<vmem>>, %arg6: memref<2x4xf32, #tpu.memory_space<vmem>>) attributes {dimension_semantics = [#tpu.dimension_semantics<parallel>], iteration_bounds = array<i64: 1>, scalar_prefetch = 1 : i64, scratch_operands = 0 : i64, tpu.core_type = #tpu.core_type<tc>, window_params = [{transform_indices = @transform_0, window_bounds = array<i64: 2, 1, 2, 8>}, {transform_indices = @transform_1, window_bounds = array<i64: 2, 4>}, {pipeline_mode = #tpu.pipeline_mode<synchronous>, transform_indices = @transform_2, window_bounds = array<i64: 848, 128>}, {pipeline_mode = #tpu.pipeline_mode<synchronous>, transform_indices = @transform_3, window_bounds = array<i64: 32, 1024>}, {transform_indices = @transform_4, window_bounds = array<i64: 2, 4>}]} {
    %c0 = arith.constant 0 : index
    %c0_0 = arith.constant 0 : index
    %c0_1 = arith.constant 0 : index
    %c0_2 = arith.constant 0 : index
    %0 = vector.load %arg2[%c0, %c0_0, %c0_1, %c0_2] : memref<2x1x2x8xf32, #tpu.memory_space<vmem>>, vector<2x1x2x8xf32>
    %1 = vector.shape_cast %0 : vector<2x1x2x8xf32> to vector<2x2x8xf32>
    %2 = vector.extract_strided_slice %1 {offsets = [0, 0, 0], sizes = [2, 1, 8], strides = [1, 1, 1]} : vector<2x2x8xf32> to vector<2x1x8xf32>
    %3 = vector.shape_cast %2 : vector<2x1x8xf32> to vector<2x8xf32>
    %4 = vector.extract_strided_slice %1 {offsets = [0, 1, 0], sizes = [2, 1, 8], strides = [1, 1, 1]} : vector<2x2x8xf32> to vector<2x1x8xf32>
    %5 = vector.shape_cast %4 : vector<2x1x8xf32> to vector<2x8xf32>
    %c840 = arith.constant 840 : index
    %c0_3 = arith.constant 0 : index
    %6 = vector.load %arg4[%c840, %c0_3] : memref<848x128xf32, #tpu.memory_space<vmem>>, vector<8x128xf32>
    %7 = vector.extract_strided_slice %6 {offsets = [0, 0], sizes = [1, 128], strides = [1, 1]} : vector<8x128xf32> to vector<1x128xf32>
    %8 = vector.extract_strided_slice %6 {offsets = [1, 0], sizes = [1, 128], strides = [1, 1]} : vector<8x128xf32> to vector<1x128xf32>
    %9 = vector.extract_strided_slice %6 {offsets = [2, 0], sizes = [1, 128], strides = [1, 1]} : vector<8x128xf32> to vector<1x128xf32>
    %10 = vector.extract_strided_slice %6 {offsets = [3, 0], sizes = [1, 128], strides = [1, 1]} : vector<8x128xf32> to vector<1x128xf32>
    %11 = vector.extract_strided_slice %6 {offsets = [4, 0], sizes = [1, 128], strides = [1, 1]} : vector<8x128xf32> to vector<1x128xf32>
    %12 = vector.extract_strided_slice %6 {offsets = [5, 0], sizes = [1, 128], strides = [1, 1]} : vector<8x128xf32> to vector<1x128xf32>
    %c0_4 = arith.constant 0 : index
    %c0_5 = arith.constant 0 : index
    %13 = vector.load %arg4[%c0_4, %c0_5] : memref<848x128xf32, #tpu.memory_space<vmem>>, vector<8x128xf32>
    %c8 = arith.constant 8 : index
    %c0_6 = arith.constant 0 : index
    %14 = vector.load %arg4[%c8, %c0_6] : memref<848x128xf32, #tpu.memory_space<vmem>>, vector<128x128xf32>
    %cst = arith.constant dense<0.000000e+00> : vector<2x128xf32>
    %15 = tpu.matmul %3, %13, %cst {dimension_numbers = #tpu.dot_dimension_numbers<[1], [0], [0], [1], [0, 0, 1, 1], [], []>} : vector<2x8xf32>, vector<8x128xf32>, vector<2x128xf32> -> vector<2x128xf32>
    %16 = vector.broadcast %7 : vector<1x128xf32> to vector<2x128xf32>
    %17 = arith.addf %15, %16 : vector<2x128xf32>
    %cst_7 = arith.constant 0.000000e+00 : f32
    %18 = vector.broadcast %cst_7 : f32 to vector<2x128xf32>
    %19 = arith.cmpf ogt, %17, %18 : vector<2x128xf32>
    %cst_8 = arith.constant 0.00999999977 : f32
    %20 = vector.broadcast %cst_8 : f32 to vector<2x128xf32>
    %21 = arith.mulf %20, %17 : vector<2x128xf32>
    %22 = arith.select %19, %17, %21 : vector<2x128xi1>, vector<2x128xf32>
    %cst_9 = arith.constant dense<0.000000e+00> : vector<2x128xf32>
    %23 = tpu.matmul %5, %13, %cst_9 {dimension_numbers = #tpu.dot_dimension_numbers<[1], [0], [0], [1], [0, 0, 1, 1], [], []>} : vector<2x8xf32>, vector<8x128xf32>, vector<2x128xf32> -> vector<2x128xf32>
    %24 = vector.broadcast %7 : vector<1x128xf32> to vector<2x128xf32>
    %25 = arith.addf %23, %24 : vector<2x128xf32>
    %cst_10 = arith.constant 0.000000e+00 : f32
    %26 = vector.broadcast %cst_10 : f32 to vector<2x128xf32>
    %27 = arith.cmpf ogt, %25, %26 : vector<2x128xf32>
    %cst_11 = arith.constant 0.00999999977 : f32
    %28 = vector.broadcast %cst_11 : f32 to vector<2x128xf32>
    %29 = arith.mulf %28, %25 : vector<2x128xf32>
    %30 = arith.select %27, %25, %29 : vector<2x128xi1>, vector<2x128xf32>
    %cst_12 = arith.constant dense<0.000000e+00> : vector<2x128xf32>
    %31 = tpu.matmul %22, %14, %cst_12 {dimension_numbers = #tpu.dot_dimension_numbers<[1], [0], [0], [1], [0, 0, 1, 1], [], []>} : vector<2x128xf32>, vector<128x128xf32>, vector<2x128xf32> -> vector<2x128xf32>
    %32 = vector.broadcast %8 : vector<1x128xf32> to vector<2x128xf32>
    %33 = arith.addf %31, %32 : vector<2x128xf32>
    %cst_13 = arith.constant 0.000000e+00 : f32
    %34 = vector.broadcast %cst_13 : f32 to vector<2x128xf32>
    %35 = arith.cmpf ogt, %33, %34 : vector<2x128xf32>
    %cst_14 = arith.constant 0.00999999977 : f32
    %36 = vector.broadcast %cst_14 : f32 to vector<2x128xf32>
    %37 = arith.mulf %36, %33 : vector<2x128xf32>
    %38 = arith.select %35, %33, %37 : vector<2x128xi1>, vector<2x128xf32>
    %cst_15 = arith.constant dense<0.000000e+00> : vector<2x128xf32>
    %39 = tpu.matmul %30, %14, %cst_15 {dimension_numbers = #tpu.dot_dimension_numbers<[1], [0], [0], [1], [0, 0, 1, 1], [], []>} : vector<2x128xf32>, vector<128x128xf32>, vector<2x128xf32> -> vector<2x128xf32>
    %40 = vector.broadcast %8 : vector<1x128xf32> to vector<2x128xf32>
    %41 = arith.addf %39, %40 : vector<2x128xf32>
    %cst_16 = arith.constant 0.000000e+00 : f32
    %42 = vector.broadcast %cst_16 : f32 to vector<2x128xf32>
    %43 = arith.cmpf ogt, %41, %42 : vector<2x128xf32>
    %cst_17 = arith.constant 0.00999999977 : f32
    %44 = vector.broadcast %cst_17 : f32 to vector<2x128xf32>
    %45 = arith.mulf %44, %41 : vector<2x128xf32>
    %46 = arith.select %43, %41, %45 : vector<2x128xi1>, vector<2x128xf32>
    %c136 = arith.constant 136 : index
    %c0_18 = arith.constant 0 : index
    %47 = vector.load %arg4[%c136, %c0_18] : memref<848x128xf32, #tpu.memory_space<vmem>>, vector<128x128xf32>
    %cst_19 = arith.constant dense<0.000000e+00> : vector<2x128xf32>
    %48 = tpu.matmul %22, %47, %cst_19 {dimension_numbers = #tpu.dot_dimension_numbers<[1], [0], [0], [1], [0, 0, 1, 1], [], []>} : vector<2x128xf32>, vector<128x128xf32>, vector<2x128xf32> -> vector<2x128xf32>
    %c264 = arith.constant 264 : index
    %c0_20 = arith.constant 0 : index
    %49 = vector.load %arg4[%c264, %c0_20] : memref<848x128xf32, #tpu.memory_space<vmem>>, vector<128x128xf32>
    %cst_21 = arith.constant dense<0.000000e+00> : vector<2x128xf32>
    %50 = tpu.matmul %30, %49, %cst_21 {dimension_numbers = #tpu.dot_dimension_numbers<[1], [0], [0], [1], [0, 0, 1, 1], [], []>} : vector<2x128xf32>, vector<128x128xf32>, vector<2x128xf32> -> vector<2x128xf32>
    %51 = arith.addf %48, %50 : vector<2x128xf32>
    %c392 = arith.constant 392 : index
    %c0_22 = arith.constant 0 : index
    %52 = vector.load %arg4[%c392, %c0_22] : memref<848x128xf32, #tpu.memory_space<vmem>>, vector<128x128xf32>
    %cst_23 = arith.constant dense<0.000000e+00> : vector<2x128xf32>
    %53 = tpu.matmul %38, %52, %cst_23 {dimension_numbers = #tpu.dot_dimension_numbers<[1], [0], [0], [1], [0, 0, 1, 1], [], []>} : vector<2x128xf32>, vector<128x128xf32>, vector<2x128xf32> -> vector<2x128xf32>
    %54 = arith.addf %51, %53 : vector<2x128xf32>
    %c520 = arith.constant 520 : index
    %c0_24 = arith.constant 0 : index
    %55 = vector.load %arg4[%c520, %c0_24] : memref<848x128xf32, #tpu.memory_space<vmem>>, vector<128x128xf32>
    %cst_25 = arith.constant dense<0.000000e+00> : vector<2x128xf32>
    %56 = tpu.matmul %46, %55, %cst_25 {dimension_numbers = #tpu.dot_dimension_numbers<[1], [0], [0], [1], [0, 0, 1, 1], [], []>} : vector<2x128xf32>, vector<128x128xf32>, vector<2x128xf32> -> vector<2x128xf32>
    %57 = arith.addf %54, %56 : vector<2x128xf32>
    %58 = vector.broadcast %10 : vector<1x128xf32> to vector<2x128xf32>
    %59 = arith.addf %57, %58 : vector<2x128xf32>
    %c0_26 = arith.constant 0 : index
    %c0_27 = arith.constant 0 : index
    %60 = vector.load %arg5[%c0_26, %c0_27] : memref<32x1024xf32, #tpu.memory_space<vmem>>, vector<8x1024xf32>
    %c8_28 = arith.constant 8 : index
    %c0_29 = arith.constant 0 : index
    %61 = vector.load %arg5[%c8_28, %c0_29] : memref<32x1024xf32, #tpu.memory_space<vmem>>, vector<8x1024xf32>
    %c16 = arith.constant 16 : index
    %c0_30 = arith.constant 0 : index
    %62 = vector.load %arg5[%c16, %c0_30] : memref<32x1024xf32, #tpu.memory_space<vmem>>, vector<1x1024xf32>
    %cst_31 = arith.constant dense<0.000000e+00> : vector<2x1024xf32>
    %63 = tpu.matmul %3, %60, %cst_31 {dimension_numbers = #tpu.dot_dimension_numbers<[1], [0], [0], [1], [0, 0, 1, 1], [], []>} : vector<2x8xf32>, vector<8x1024xf32>, vector<2x1024xf32> -> vector<2x1024xf32>
    %cst_32 = arith.constant dense<0.000000e+00> : vector<2x1024xf32>
    %64 = tpu.matmul %5, %61, %cst_32 {dimension_numbers = #tpu.dot_dimension_numbers<[1], [0], [0], [1], [0, 0, 1, 1], [], []>} : vector<2x8xf32>, vector<8x1024xf32>, vector<2x1024xf32> -> vector<2x1024xf32>
    %65 = arith.addf %63, %64 : vector<2x1024xf32>
    %66 = vector.broadcast %62 : vector<1x1024xf32> to vector<2x1024xf32>
    %67 = arith.addf %65, %66 : vector<2x1024xf32>
    %c648 = arith.constant 648 : index
    %c0_33 = arith.constant 0 : index
    %68 = vector.load %arg4[%c648, %c0_33] : memref<848x128xf32, #tpu.memory_space<vmem>>, vector<32x128xf32>
    %c680 = arith.constant 680 : index
    %c0_34 = arith.constant 0 : index
    %69 = vector.load %arg4[%c680, %c0_34] : memref<848x128xf32, #tpu.memory_space<vmem>>, vector<32x128xf32>
    %cst_35 = arith.constant 0.000000e+00 : f32
    %70 = vector.broadcast %cst_35 : f32 to vector<2x32xf32>
    %71 = vector.extract_strided_slice %67 {offsets = [0, 0], sizes = [2, 128], strides = [1, 1]} : vector<2x1024xf32> to vector<2x128xf32>
    %cst_36 = arith.constant dense<0.000000e+00> : vector<2x128xf32>
    %72 = tpu.matmul %70, %68, %cst_36 {dimension_numbers = #tpu.dot_dimension_numbers<[1], [0], [0], [1], [0, 0, 1, 1], [], []>} : vector<2x32xf32>, vector<32x128xf32>, vector<2x128xf32> -> vector<2x128xf32>
    %73 = vector.broadcast %9 : vector<1x128xf32> to vector<2x128xf32>
    %74 = arith.addf %72, %73 : vector<2x128xf32>
    %75 = vector.extract_strided_slice %71 {offsets = [0, 0], sizes = [2, 32], strides = [1, 1]} : vector<2x128xf32> to vector<2x32xf32>
    %76 = vector.extract_strided_slice %74 {offsets = [0, 0], sizes = [2, 32], strides = [1, 1]} : vector<2x128xf32> to vector<2x32xf32>
    %77 = arith.addf %75, %76 : vector<2x32xf32>
    %78 = arith.negf %77 : vector<2x32xf32>
    %79 = math.exp %78 : vector<2x32xf32>
    %cst_37 = arith.constant 1.000000e+00 : f32
    %80 = vector.broadcast %cst_37 : f32 to vector<2x32xf32>
    %81 = arith.addf %80, %79 : vector<2x32xf32>
    %82 = arith.divf %80, %81 : vector<2x32xf32>
    %83 = vector.extract_strided_slice %71 {offsets = [0, 32], sizes = [2, 32], strides = [1, 1]} : vector<2x128xf32> to vector<2x32xf32>
    %84 = vector.extract_strided_slice %74 {offsets = [0, 32], sizes = [2, 32], strides = [1, 1]} : vector<2x128xf32> to vector<2x32xf32>
    %85 = arith.addf %83, %84 : vector<2x32xf32>
    %86 = arith.negf %85 : vector<2x32xf32>
    %87 = math.exp %86 : vector<2x32xf32>
    %cst_38 = arith.constant 1.000000e+00 : f32
    %88 = vector.broadcast %cst_38 : f32 to vector<2x32xf32>
    %89 = arith.addf %88, %87 : vector<2x32xf32>
    %90 = arith.divf %88, %89 : vector<2x32xf32>
    %91 = vector.extract_strided_slice %71 {offsets = [0, 64], sizes = [2, 32], strides = [1, 1]} : vector<2x128xf32> to vector<2x32xf32>
    %92 = vector.extract_strided_slice %74 {offsets = [0, 64], sizes = [2, 32], strides = [1, 1]} : vector<2x128xf32> to vector<2x32xf32>
    %93 = arith.mulf %82, %92 : vector<2x32xf32>
    %94 = arith.addf %91, %93 : vector<2x32xf32>
    %95 = math.tanh %94 : vector<2x32xf32>
    %cst_39 = arith.constant 1.000000e+00 : f32
    %96 = vector.broadcast %cst_39 : f32 to vector<2x32xf32>
    %97 = arith.subf %96, %90 : vector<2x32xf32>
    %98 = arith.mulf %97, %95 : vector<2x32xf32>
    %99 = arith.mulf %90, %70 : vector<2x32xf32>
    %100 = arith.addf %98, %99 : vector<2x32xf32>
    %101 = vector.extract_strided_slice %67 {offsets = [0, 128], sizes = [2, 128], strides = [1, 1]} : vector<2x1024xf32> to vector<2x128xf32>
    %cst_40 = arith.constant dense<0.000000e+00> : vector<2x128xf32>
    %102 = tpu.matmul %100, %68, %cst_40 {dimension_numbers = #tpu.dot_dimension_numbers<[1], [0], [0], [1], [0, 0, 1, 1], [], []>} : vector<2x32xf32>, vector<32x128xf32>, vector<2x128xf32> -> vector<2x128xf32>
    %103 = vector.broadcast %9 : vector<1x128xf32> to vector<2x128xf32>
    %104 = arith.addf %102, %103 : vector<2x128xf32>
    %105 = vector.extract_strided_slice %101 {offsets = [0, 0], sizes = [2, 32], strides = [1, 1]} : vector<2x128xf32> to vector<2x32xf32>
    %106 = vector.extract_strided_slice %104 {offsets = [0, 0], sizes = [2, 32], strides = [1, 1]} : vector<2x128xf32> to vector<2x32xf32>
    %107 = arith.addf %105, %106 : vector<2x32xf32>
    %108 = arith.negf %107 : vector<2x32xf32>
    %109 = math.exp %108 : vector<2x32xf32>
    %cst_41 = arith.constant 1.000000e+00 : f32
    %110 = vector.broadcast %cst_41 : f32 to vector<2x32xf32>
    %111 = arith.addf %110, %109 : vector<2x32xf32>
    %112 = arith.divf %110, %111 : vector<2x32xf32>
    %113 = vector.extract_strided_slice %101 {offsets = [0, 32], sizes = [2, 32], strides = [1, 1]} : vector<2x128xf32> to vector<2x32xf32>
    %114 = vector.extract_strided_slice %104 {offsets = [0, 32], sizes = [2, 32], strides = [1, 1]} : vector<2x128xf32> to vector<2x32xf32>
    %115 = arith.addf %113, %114 : vector<2x32xf32>
    %116 = arith.negf %115 : vector<2x32xf32>
    %117 = math.exp %116 : vector<2x32xf32>
    %cst_42 = arith.constant 1.000000e+00 : f32
    %118 = vector.broadcast %cst_42 : f32 to vector<2x32xf32>
    %119 = arith.addf %118, %117 : vector<2x32xf32>
    %120 = arith.divf %118, %119 : vector<2x32xf32>
    %121 = vector.extract_strided_slice %101 {offsets = [0, 64], sizes = [2, 32], strides = [1, 1]} : vector<2x128xf32> to vector<2x32xf32>
    %122 = vector.extract_strided_slice %104 {offsets = [0, 64], sizes = [2, 32], strides = [1, 1]} : vector<2x128xf32> to vector<2x32xf32>
    %123 = arith.mulf %112, %122 : vector<2x32xf32>
    %124 = arith.addf %121, %123 : vector<2x32xf32>
    %125 = math.tanh %124 : vector<2x32xf32>
    %cst_43 = arith.constant 1.000000e+00 : f32
    %126 = vector.broadcast %cst_43 : f32 to vector<2x32xf32>
    %127 = arith.subf %126, %120 : vector<2x32xf32>
    %128 = arith.mulf %127, %125 : vector<2x32xf32>
    %129 = arith.mulf %120, %100 : vector<2x32xf32>
    %130 = arith.addf %128, %129 : vector<2x32xf32>
    %131 = vector.extract_strided_slice %67 {offsets = [0, 256], sizes = [2, 128], strides = [1, 1]} : vector<2x1024xf32> to vector<2x128xf32>
    %cst_44 = arith.constant dense<0.000000e+00> : vector<2x128xf32>
    %132 = tpu.matmul %130, %68, %cst_44 {dimension_numbers = #tpu.dot_dimension_numbers<[1], [0], [0], [1], [0, 0, 1, 1], [], []>} : vector<2x32xf32>, vector<32x128xf32>, vector<2x128xf32> -> vector<2x128xf32>
    %133 = vector.broadcast %9 : vector<1x128xf32> to vector<2x128xf32>
    %134 = arith.addf %132, %133 : vector<2x128xf32>
    %135 = vector.extract_strided_slice %131 {offsets = [0, 0], sizes = [2, 32], strides = [1, 1]} : vector<2x128xf32> to vector<2x32xf32>
    %136 = vector.extract_strided_slice %134 {offsets = [0, 0], sizes = [2, 32], strides = [1, 1]} : vector<2x128xf32> to vector<2x32xf32>
    %137 = arith.addf %135, %136 : vector<2x32xf32>
    %138 = arith.negf %137 : vector<2x32xf32>
    %139 = math.exp %138 : vector<2x32xf32>
    %cst_45 = arith.constant 1.000000e+00 : f32
    %140 = vector.broadcast %cst_45 : f32 to vector<2x32xf32>
    %141 = arith.addf %140, %139 : vector<2x32xf32>
    %142 = arith.divf %140, %141 : vector<2x32xf32>
    %143 = vector.extract_strided_slice %131 {offsets = [0, 32], sizes = [2, 32], strides = [1, 1]} : vector<2x128xf32> to vector<2x32xf32>
    %144 = vector.extract_strided_slice %134 {offsets = [0, 32], sizes = [2, 32], strides = [1, 1]} : vector<2x128xf32> to vector<2x32xf32>
    %145 = arith.addf %143, %144 : vector<2x32xf32>
    %146 = arith.negf %145 : vector<2x32xf32>
    %147 = math.exp %146 : vector<2x32xf32>
    %cst_46 = arith.constant 1.000000e+00 : f32
    %148 = vector.broadcast %cst_46 : f32 to vector<2x32xf32>
    %149 = arith.addf %148, %147 : vector<2x32xf32>
    %150 = arith.divf %148, %149 : vector<2x32xf32>
    %151 = vector.extract_strided_slice %131 {offsets = [0, 64], sizes = [2, 32], strides = [1, 1]} : vector<2x128xf32> to vector<2x32xf32>
    %152 = vector.extract_strided_slice %134 {offsets = [0, 64], sizes = [2, 32], strides = [1, 1]} : vector<2x128xf32> to vector<2x32xf32>
    %153 = arith.mulf %142, %152 : vector<2x32xf32>
    %154 = arith.addf %151, %153 : vector<2x32xf32>
    %155 = math.tanh %154 : vector<2x32xf32>
    %cst_47 = arith.constant 1.000000e+00 : f32
    %156 = vector.broadcast %cst_47 : f32 to vector<2x32xf32>
    %157 = arith.subf %156, %150 : vector<2x32xf32>
    %158 = arith.mulf %157, %155 : vector<2x32xf32>
    %159 = arith.mulf %150, %130 : vector<2x32xf32>
    %160 = arith.addf %158, %159 : vector<2x32xf32>
    %161 = vector.extract_strided_slice %67 {offsets = [0, 384], sizes = [2, 128], strides = [1, 1]} : vector<2x1024xf32> to vector<2x128xf32>
    %cst_48 = arith.constant dense<0.000000e+00> : vector<2x128xf32>
    %162 = tpu.matmul %160, %68, %cst_48 {dimension_numbers = #tpu.dot_dimension_numbers<[1], [0], [0], [1], [0, 0, 1, 1], [], []>} : vector<2x32xf32>, vector<32x128xf32>, vector<2x128xf32> -> vector<2x128xf32>
    %163 = vector.broadcast %9 : vector<1x128xf32> to vector<2x128xf32>
    %164 = arith.addf %162, %163 : vector<2x128xf32>
    %165 = vector.extract_strided_slice %161 {offsets = [0, 0], sizes = [2, 32], strides = [1, 1]} : vector<2x128xf32> to vector<2x32xf32>
    %166 = vector.extract_strided_slice %164 {offsets = [0, 0], sizes = [2, 32], strides = [1, 1]} : vector<2x128xf32> to vector<2x32xf32>
    %167 = arith.addf %165, %166 : vector<2x32xf32>
    %168 = arith.negf %167 : vector<2x32xf32>
    %169 = math.exp %168 : vector<2x32xf32>
    %cst_49 = arith.constant 1.000000e+00 : f32
    %170 = vector.broadcast %cst_49 : f32 to vector<2x32xf32>
    %171 = arith.addf %170, %169 : vector<2x32xf32>
    %172 = arith.divf %170, %171 : vector<2x32xf32>
    %173 = vector.extract_strided_slice %161 {offsets = [0, 32], sizes = [2, 32], strides = [1, 1]} : vector<2x128xf32> to vector<2x32xf32>
    %174 = vector.extract_strided_slice %164 {offsets = [0, 32], sizes = [2, 32], strides = [1, 1]} : vector<2x128xf32> to vector<2x32xf32>
    %175 = arith.addf %173, %174 : vector<2x32xf32>
    %176 = arith.negf %175 : vector<2x32xf32>
    %177 = math.exp %176 : vector<2x32xf32>
    %cst_50 = arith.constant 1.000000e+00 : f32
    %178 = vector.broadcast %cst_50 : f32 to vector<2x32xf32>
    %179 = arith.addf %178, %177 : vector<2x32xf32>
    %180 = arith.divf %178, %179 : vector<2x32xf32>
    %181 = vector.extract_strided_slice %161 {offsets = [0, 64], sizes = [2, 32], strides = [1, 1]} : vector<2x128xf32> to vector<2x32xf32>
    %182 = vector.extract_strided_slice %164 {offsets = [0, 64], sizes = [2, 32], strides = [1, 1]} : vector<2x128xf32> to vector<2x32xf32>
    %183 = arith.mulf %172, %182 : vector<2x32xf32>
    %184 = arith.addf %181, %183 : vector<2x32xf32>
    %185 = math.tanh %184 : vector<2x32xf32>
    %cst_51 = arith.constant 1.000000e+00 : f32
    %186 = vector.broadcast %cst_51 : f32 to vector<2x32xf32>
    %187 = arith.subf %186, %180 : vector<2x32xf32>
    %188 = arith.mulf %187, %185 : vector<2x32xf32>
    %189 = arith.mulf %180, %160 : vector<2x32xf32>
    %190 = arith.addf %188, %189 : vector<2x32xf32>
    %191 = vector.extract_strided_slice %67 {offsets = [0, 512], sizes = [2, 128], strides = [1, 1]} : vector<2x1024xf32> to vector<2x128xf32>
    %cst_52 = arith.constant dense<0.000000e+00> : vector<2x128xf32>
    %192 = tpu.matmul %190, %68, %cst_52 {dimension_numbers = #tpu.dot_dimension_numbers<[1], [0], [0], [1], [0, 0, 1, 1], [], []>} : vector<2x32xf32>, vector<32x128xf32>, vector<2x128xf32> -> vector<2x128xf32>
    %193 = vector.broadcast %9 : vector<1x128xf32> to vector<2x128xf32>
    %194 = arith.addf %192, %193 : vector<2x128xf32>
    %195 = vector.extract_strided_slice %191 {offsets = [0, 0], sizes = [2, 32], strides = [1, 1]} : vector<2x128xf32> to vector<2x32xf32>
    %196 = vector.extract_strided_slice %194 {offsets = [0, 0], sizes = [2, 32], strides = [1, 1]} : vector<2x128xf32> to vector<2x32xf32>
    %197 = arith.addf %195, %196 : vector<2x32xf32>
    %198 = arith.negf %197 : vector<2x32xf32>
    %199 = math.exp %198 : vector<2x32xf32>
    %cst_53 = arith.constant 1.000000e+00 : f32
    %200 = vector.broadcast %cst_53 : f32 to vector<2x32xf32>
    %201 = arith.addf %200, %199 : vector<2x32xf32>
    %202 = arith.divf %200, %201 : vector<2x32xf32>
    %203 = vector.extract_strided_slice %191 {offsets = [0, 32], sizes = [2, 32], strides = [1, 1]} : vector<2x128xf32> to vector<2x32xf32>
    %204 = vector.extract_strided_slice %194 {offsets = [0, 32], sizes = [2, 32], strides = [1, 1]} : vector<2x128xf32> to vector<2x32xf32>
    %205 = arith.addf %203, %204 : vector<2x32xf32>
    %206 = arith.negf %205 : vector<2x32xf32>
    %207 = math.exp %206 : vector<2x32xf32>
    %cst_54 = arith.constant 1.000000e+00 : f32
    %208 = vector.broadcast %cst_54 : f32 to vector<2x32xf32>
    %209 = arith.addf %208, %207 : vector<2x32xf32>
    %210 = arith.divf %208, %209 : vector<2x32xf32>
    %211 = vector.extract_strided_slice %191 {offsets = [0, 64], sizes = [2, 32], strides = [1, 1]} : vector<2x128xf32> to vector<2x32xf32>
    %212 = vector.extract_strided_slice %194 {offsets = [0, 64], sizes = [2, 32], strides = [1, 1]} : vector<2x128xf32> to vector<2x32xf32>
    %213 = arith.mulf %202, %212 : vector<2x32xf32>
    %214 = arith.addf %211, %213 : vector<2x32xf32>
    %215 = math.tanh %214 : vector<2x32xf32>
    %cst_55 = arith.constant 1.000000e+00 : f32
    %216 = vector.broadcast %cst_55 : f32 to vector<2x32xf32>
    %217 = arith.subf %216, %210 : vector<2x32xf32>
    %218 = arith.mulf %217, %215 : vector<2x32xf32>
    %219 = arith.mulf %210, %190 : vector<2x32xf32>
    %220 = arith.addf %218, %219 : vector<2x32xf32>
    %221 = vector.extract_strided_slice %67 {offsets = [0, 640], sizes = [2, 128], strides = [1, 1]} : vector<2x1024xf32> to vector<2x128xf32>
    %cst_56 = arith.constant dense<0.000000e+00> : vector<2x128xf32>
    %222 = tpu.matmul %220, %68, %cst_56 {dimension_numbers = #tpu.dot_dimension_numbers<[1], [0], [0], [1], [0, 0, 1, 1], [], []>} : vector<2x32xf32>, vector<32x128xf32>, vector<2x128xf32> -> vector<2x128xf32>
    %223 = vector.broadcast %9 : vector<1x128xf32> to vector<2x128xf32>
    %224 = arith.addf %222, %223 : vector<2x128xf32>
    %225 = vector.extract_strided_slice %221 {offsets = [0, 0], sizes = [2, 32], strides = [1, 1]} : vector<2x128xf32> to vector<2x32xf32>
    %226 = vector.extract_strided_slice %224 {offsets = [0, 0], sizes = [2, 32], strides = [1, 1]} : vector<2x128xf32> to vector<2x32xf32>
    %227 = arith.addf %225, %226 : vector<2x32xf32>
    %228 = arith.negf %227 : vector<2x32xf32>
    %229 = math.exp %228 : vector<2x32xf32>
    %cst_57 = arith.constant 1.000000e+00 : f32
    %230 = vector.broadcast %cst_57 : f32 to vector<2x32xf32>
    %231 = arith.addf %230, %229 : vector<2x32xf32>
    %232 = arith.divf %230, %231 : vector<2x32xf32>
    %233 = vector.extract_strided_slice %221 {offsets = [0, 32], sizes = [2, 32], strides = [1, 1]} : vector<2x128xf32> to vector<2x32xf32>
    %234 = vector.extract_strided_slice %224 {offsets = [0, 32], sizes = [2, 32], strides = [1, 1]} : vector<2x128xf32> to vector<2x32xf32>
    %235 = arith.addf %233, %234 : vector<2x32xf32>
    %236 = arith.negf %235 : vector<2x32xf32>
    %237 = math.exp %236 : vector<2x32xf32>
    %cst_58 = arith.constant 1.000000e+00 : f32
    %238 = vector.broadcast %cst_58 : f32 to vector<2x32xf32>
    %239 = arith.addf %238, %237 : vector<2x32xf32>
    %240 = arith.divf %238, %239 : vector<2x32xf32>
    %241 = vector.extract_strided_slice %221 {offsets = [0, 64], sizes = [2, 32], strides = [1, 1]} : vector<2x128xf32> to vector<2x32xf32>
    %242 = vector.extract_strided_slice %224 {offsets = [0, 64], sizes = [2, 32], strides = [1, 1]} : vector<2x128xf32> to vector<2x32xf32>
    %243 = arith.mulf %232, %242 : vector<2x32xf32>
    %244 = arith.addf %241, %243 : vector<2x32xf32>
    %245 = math.tanh %244 : vector<2x32xf32>
    %cst_59 = arith.constant 1.000000e+00 : f32
    %246 = vector.broadcast %cst_59 : f32 to vector<2x32xf32>
    %247 = arith.subf %246, %240 : vector<2x32xf32>
    %248 = arith.mulf %247, %245 : vector<2x32xf32>
    %249 = arith.mulf %240, %220 : vector<2x32xf32>
    %250 = arith.addf %248, %249 : vector<2x32xf32>
    %251 = vector.extract_strided_slice %67 {offsets = [0, 768], sizes = [2, 128], strides = [1, 1]} : vector<2x1024xf32> to vector<2x128xf32>
    %cst_60 = arith.constant dense<0.000000e+00> : vector<2x128xf32>
    %252 = tpu.matmul %250, %68, %cst_60 {dimension_numbers = #tpu.dot_dimension_numbers<[1], [0], [0], [1], [0, 0, 1, 1], [], []>} : vector<2x32xf32>, vector<32x128xf32>, vector<2x128xf32> -> vector<2x128xf32>
    %253 = vector.broadcast %9 : vector<1x128xf32> to vector<2x128xf32>
    %254 = arith.addf %252, %253 : vector<2x128xf32>
    %255 = vector.extract_strided_slice %251 {offsets = [0, 0], sizes = [2, 32], strides = [1, 1]} : vector<2x128xf32> to vector<2x32xf32>
    %256 = vector.extract_strided_slice %254 {offsets = [0, 0], sizes = [2, 32], strides = [1, 1]} : vector<2x128xf32> to vector<2x32xf32>
    %257 = arith.addf %255, %256 : vector<2x32xf32>
    %258 = arith.negf %257 : vector<2x32xf32>
    %259 = math.exp %258 : vector<2x32xf32>
    %cst_61 = arith.constant 1.000000e+00 : f32
    %260 = vector.broadcast %cst_61 : f32 to vector<2x32xf32>
    %261 = arith.addf %260, %259 : vector<2x32xf32>
    %262 = arith.divf %260, %261 : vector<2x32xf32>
    %263 = vector.extract_strided_slice %251 {offsets = [0, 32], sizes = [2, 32], strides = [1, 1]} : vector<2x128xf32> to vector<2x32xf32>
    %264 = vector.extract_strided_slice %254 {offsets = [0, 32], sizes = [2, 32], strides = [1, 1]} : vector<2x128xf32> to vector<2x32xf32>
    %265 = arith.addf %263, %264 : vector<2x32xf32>
    %266 = arith.negf %265 : vector<2x32xf32>
    %267 = math.exp %266 : vector<2x32xf32>
    %cst_62 = arith.constant 1.000000e+00 : f32
    %268 = vector.broadcast %cst_62 : f32 to vector<2x32xf32>
    %269 = arith.addf %268, %267 : vector<2x32xf32>
    %270 = arith.divf %268, %269 : vector<2x32xf32>
    %271 = vector.extract_strided_slice %251 {offsets = [0, 64], sizes = [2, 32], strides = [1, 1]} : vector<2x128xf32> to vector<2x32xf32>
    %272 = vector.extract_strided_slice %254 {offsets = [0, 64], sizes = [2, 32], strides = [1, 1]} : vector<2x128xf32> to vector<2x32xf32>
    %273 = arith.mulf %262, %272 : vector<2x32xf32>
    %274 = arith.addf %271, %273 : vector<2x32xf32>
    %275 = math.tanh %274 : vector<2x32xf32>
    %cst_63 = arith.constant 1.000000e+00 : f32
    %276 = vector.broadcast %cst_63 : f32 to vector<2x32xf32>
    %277 = arith.subf %276, %270 : vector<2x32xf32>
    %278 = arith.mulf %277, %275 : vector<2x32xf32>
    %279 = arith.mulf %270, %250 : vector<2x32xf32>
    %280 = arith.addf %278, %279 : vector<2x32xf32>
    %281 = vector.extract_strided_slice %67 {offsets = [0, 896], sizes = [2, 128], strides = [1, 1]} : vector<2x1024xf32> to vector<2x128xf32>
    %cst_64 = arith.constant dense<0.000000e+00> : vector<2x128xf32>
    %282 = tpu.matmul %280, %68, %cst_64 {dimension_numbers = #tpu.dot_dimension_numbers<[1], [0], [0], [1], [0, 0, 1, 1], [], []>} : vector<2x32xf32>, vector<32x128xf32>, vector<2x128xf32> -> vector<2x128xf32>
    %283 = vector.broadcast %9 : vector<1x128xf32> to vector<2x128xf32>
    %284 = arith.addf %282, %283 : vector<2x128xf32>
    %285 = vector.extract_strided_slice %281 {offsets = [0, 0], sizes = [2, 32], strides = [1, 1]} : vector<2x128xf32> to vector<2x32xf32>
    %286 = vector.extract_strided_slice %284 {offsets = [0, 0], sizes = [2, 32], strides = [1, 1]} : vector<2x128xf32> to vector<2x32xf32>
    %287 = arith.addf %285, %286 : vector<2x32xf32>
    %288 = arith.negf %287 : vector<2x32xf32>
    %289 = math.exp %288 : vector<2x32xf32>
    %cst_65 = arith.constant 1.000000e+00 : f32
    %290 = vector.broadcast %cst_65 : f32 to vector<2x32xf32>
    %291 = arith.addf %290, %289 : vector<2x32xf32>
    %292 = arith.divf %290, %291 : vector<2x32xf32>
    %293 = vector.extract_strided_slice %281 {offsets = [0, 32], sizes = [2, 32], strides = [1, 1]} : vector<2x128xf32> to vector<2x32xf32>
    %294 = vector.extract_strided_slice %284 {offsets = [0, 32], sizes = [2, 32], strides = [1, 1]} : vector<2x128xf32> to vector<2x32xf32>
    %295 = arith.addf %293, %294 : vector<2x32xf32>
    %296 = arith.negf %295 : vector<2x32xf32>
    %297 = math.exp %296 : vector<2x32xf32>
    %cst_66 = arith.constant 1.000000e+00 : f32
    %298 = vector.broadcast %cst_66 : f32 to vector<2x32xf32>
    %299 = arith.addf %298, %297 : vector<2x32xf32>
    %300 = arith.divf %298, %299 : vector<2x32xf32>
    %301 = vector.extract_strided_slice %281 {offsets = [0, 64], sizes = [2, 32], strides = [1, 1]} : vector<2x128xf32> to vector<2x32xf32>
    %302 = vector.extract_strided_slice %284 {offsets = [0, 64], sizes = [2, 32], strides = [1, 1]} : vector<2x128xf32> to vector<2x32xf32>
    %303 = arith.mulf %292, %302 : vector<2x32xf32>
    %304 = arith.addf %301, %303 : vector<2x32xf32>
    %305 = math.tanh %304 : vector<2x32xf32>
    %cst_67 = arith.constant 1.000000e+00 : f32
    %306 = vector.broadcast %cst_67 : f32 to vector<2x32xf32>
    %307 = arith.subf %306, %300 : vector<2x32xf32>
    %308 = arith.mulf %307, %305 : vector<2x32xf32>
    %309 = arith.mulf %300, %280 : vector<2x32xf32>
    %310 = arith.addf %308, %309 : vector<2x32xf32>
    %c24 = arith.constant 24 : index
    %c0_68 = arith.constant 0 : index
    %311 = vector.load %arg5[%c24, %c0_68] : memref<32x1024xf32, #tpu.memory_space<vmem>>, vector<4x512xf32>
    %c0_69 = arith.constant 0 : index
    %c0_70 = arith.constant 0 : index
    %312 = vector.load %arg3[%c0_69, %c0_70] : memref<2x4xf32, #tpu.memory_space<vmem>>, vector<2x4xf32>
    %cst_71 = arith.constant dense<0.000000e+00> : vector<2x512xf32>
    %313 = tpu.matmul %312, %311, %cst_71 {dimension_numbers = #tpu.dot_dimension_numbers<[1], [0], [0], [1], [0, 0, 1, 1], [], []>} : vector<2x4xf32>, vector<4x512xf32>, vector<2x512xf32> -> vector<2x512xf32>
    %314 = vector.extract_strided_slice %313 {offsets = [0, 0], sizes = [2, 128], strides = [1, 1]} : vector<2x512xf32> to vector<2x128xf32>
    %315 = arith.addf %314, %59 : vector<2x128xf32>
    %cst_72 = arith.constant dense<0.000000e+00> : vector<2x128xf32>
    %316 = tpu.matmul %310, %69, %cst_72 {dimension_numbers = #tpu.dot_dimension_numbers<[1], [0], [0], [1], [0, 0, 1, 1], [], []>} : vector<2x32xf32>, vector<32x128xf32>, vector<2x128xf32> -> vector<2x128xf32>
    %317 = vector.broadcast %11 : vector<1x128xf32> to vector<2x128xf32>
    %318 = arith.addf %316, %317 : vector<2x128xf32>
    %319 = vector.extract_strided_slice %315 {offsets = [0, 0], sizes = [2, 32], strides = [1, 1]} : vector<2x128xf32> to vector<2x32xf32>
    %320 = vector.extract_strided_slice %318 {offsets = [0, 0], sizes = [2, 32], strides = [1, 1]} : vector<2x128xf32> to vector<2x32xf32>
    %321 = arith.addf %319, %320 : vector<2x32xf32>
    %322 = arith.negf %321 : vector<2x32xf32>
    %323 = math.exp %322 : vector<2x32xf32>
    %cst_73 = arith.constant 1.000000e+00 : f32
    %324 = vector.broadcast %cst_73 : f32 to vector<2x32xf32>
    %325 = arith.addf %324, %323 : vector<2x32xf32>
    %326 = arith.divf %324, %325 : vector<2x32xf32>
    %327 = vector.extract_strided_slice %315 {offsets = [0, 32], sizes = [2, 32], strides = [1, 1]} : vector<2x128xf32> to vector<2x32xf32>
    %328 = vector.extract_strided_slice %318 {offsets = [0, 32], sizes = [2, 32], strides = [1, 1]} : vector<2x128xf32> to vector<2x32xf32>
    %329 = arith.addf %327, %328 : vector<2x32xf32>
    %330 = arith.negf %329 : vector<2x32xf32>
    %331 = math.exp %330 : vector<2x32xf32>
    %cst_74 = arith.constant 1.000000e+00 : f32
    %332 = vector.broadcast %cst_74 : f32 to vector<2x32xf32>
    %333 = arith.addf %332, %331 : vector<2x32xf32>
    %334 = arith.divf %332, %333 : vector<2x32xf32>
    %335 = vector.extract_strided_slice %315 {offsets = [0, 64], sizes = [2, 32], strides = [1, 1]} : vector<2x128xf32> to vector<2x32xf32>
    %336 = vector.extract_strided_slice %318 {offsets = [0, 64], sizes = [2, 32], strides = [1, 1]} : vector<2x128xf32> to vector<2x32xf32>
    %337 = arith.mulf %326, %336 : vector<2x32xf32>
    %338 = arith.addf %335, %337 : vector<2x32xf32>
    %339 = math.tanh %338 : vector<2x32xf32>
    %cst_75 = arith.constant 1.000000e+00 : f32
    %340 = vector.broadcast %cst_75 : f32 to vector<2x32xf32>
    %341 = arith.subf %340, %334 : vector<2x32xf32>
    %342 = arith.mulf %341, %339 : vector<2x32xf32>
    %343 = arith.mulf %334, %310 : vector<2x32xf32>
    %344 = arith.addf %342, %343 : vector<2x32xf32>
    %345 = vector.extract_strided_slice %313 {offsets = [0, 128], sizes = [2, 128], strides = [1, 1]} : vector<2x512xf32> to vector<2x128xf32>
    %346 = arith.addf %345, %59 : vector<2x128xf32>
    %cst_76 = arith.constant dense<0.000000e+00> : vector<2x128xf32>
    %347 = tpu.matmul %344, %69, %cst_76 {dimension_numbers = #tpu.dot_dimension_numbers<[1], [0], [0], [1], [0, 0, 1, 1], [], []>} : vector<2x32xf32>, vector<32x128xf32>, vector<2x128xf32> -> vector<2x128xf32>
    %348 = vector.broadcast %11 : vector<1x128xf32> to vector<2x128xf32>
    %349 = arith.addf %347, %348 : vector<2x128xf32>
    %350 = vector.extract_strided_slice %346 {offsets = [0, 0], sizes = [2, 32], strides = [1, 1]} : vector<2x128xf32> to vector<2x32xf32>
    %351 = vector.extract_strided_slice %349 {offsets = [0, 0], sizes = [2, 32], strides = [1, 1]} : vector<2x128xf32> to vector<2x32xf32>
    %352 = arith.addf %350, %351 : vector<2x32xf32>
    %353 = arith.negf %352 : vector<2x32xf32>
    %354 = math.exp %353 : vector<2x32xf32>
    %cst_77 = arith.constant 1.000000e+00 : f32
    %355 = vector.broadcast %cst_77 : f32 to vector<2x32xf32>
    %356 = arith.addf %355, %354 : vector<2x32xf32>
    %357 = arith.divf %355, %356 : vector<2x32xf32>
    %358 = vector.extract_strided_slice %346 {offsets = [0, 32], sizes = [2, 32], strides = [1, 1]} : vector<2x128xf32> to vector<2x32xf32>
    %359 = vector.extract_strided_slice %349 {offsets = [0, 32], sizes = [2, 32], strides = [1, 1]} : vector<2x128xf32> to vector<2x32xf32>
    %360 = arith.addf %358, %359 : vector<2x32xf32>
    %361 = arith.negf %360 : vector<2x32xf32>
    %362 = math.exp %361 : vector<2x32xf32>
    %cst_78 = arith.constant 1.000000e+00 : f32
    %363 = vector.broadcast %cst_78 : f32 to vector<2x32xf32>
    %364 = arith.addf %363, %362 : vector<2x32xf32>
    %365 = arith.divf %363, %364 : vector<2x32xf32>
    %366 = vector.extract_strided_slice %346 {offsets = [0, 64], sizes = [2, 32], strides = [1, 1]} : vector<2x128xf32> to vector<2x32xf32>
    %367 = vector.extract_strided_slice %349 {offsets = [0, 64], sizes = [2, 32], strides = [1, 1]} : vector<2x128xf32> to vector<2x32xf32>
    %368 = arith.mulf %357, %367 : vector<2x32xf32>
    %369 = arith.addf %366, %368 : vector<2x32xf32>
    %370 = math.tanh %369 : vector<2x32xf32>
    %cst_79 = arith.constant 1.000000e+00 : f32
    %371 = vector.broadcast %cst_79 : f32 to vector<2x32xf32>
    %372 = arith.subf %371, %365 : vector<2x32xf32>
    %373 = arith.mulf %372, %370 : vector<2x32xf32>
    %374 = arith.mulf %365, %344 : vector<2x32xf32>
    %375 = arith.addf %373, %374 : vector<2x32xf32>
    %376 = vector.extract_strided_slice %313 {offsets = [0, 256], sizes = [2, 128], strides = [1, 1]} : vector<2x512xf32> to vector<2x128xf32>
    %377 = arith.addf %376, %59 : vector<2x128xf32>
    %cst_80 = arith.constant dense<0.000000e+00> : vector<2x128xf32>
    %378 = tpu.matmul %375, %69, %cst_80 {dimension_numbers = #tpu.dot_dimension_numbers<[1], [0], [0], [1], [0, 0, 1, 1], [], []>} : vector<2x32xf32>, vector<32x128xf32>, vector<2x128xf32> -> vector<2x128xf32>
    %379 = vector.broadcast %11 : vector<1x128xf32> to vector<2x128xf32>
    %380 = arith.addf %378, %379 : vector<2x128xf32>
    %381 = vector.extract_strided_slice %377 {offsets = [0, 0], sizes = [2, 32], strides = [1, 1]} : vector<2x128xf32> to vector<2x32xf32>
    %382 = vector.extract_strided_slice %380 {offsets = [0, 0], sizes = [2, 32], strides = [1, 1]} : vector<2x128xf32> to vector<2x32xf32>
    %383 = arith.addf %381, %382 : vector<2x32xf32>
    %384 = arith.negf %383 : vector<2x32xf32>
    %385 = math.exp %384 : vector<2x32xf32>
    %cst_81 = arith.constant 1.000000e+00 : f32
    %386 = vector.broadcast %cst_81 : f32 to vector<2x32xf32>
    %387 = arith.addf %386, %385 : vector<2x32xf32>
    %388 = arith.divf %386, %387 : vector<2x32xf32>
    %389 = vector.extract_strided_slice %377 {offsets = [0, 32], sizes = [2, 32], strides = [1, 1]} : vector<2x128xf32> to vector<2x32xf32>
    %390 = vector.extract_strided_slice %380 {offsets = [0, 32], sizes = [2, 32], strides = [1, 1]} : vector<2x128xf32> to vector<2x32xf32>
    %391 = arith.addf %389, %390 : vector<2x32xf32>
    %392 = arith.negf %391 : vector<2x32xf32>
    %393 = math.exp %392 : vector<2x32xf32>
    %cst_82 = arith.constant 1.000000e+00 : f32
    %394 = vector.broadcast %cst_82 : f32 to vector<2x32xf32>
    %395 = arith.addf %394, %393 : vector<2x32xf32>
    %396 = arith.divf %394, %395 : vector<2x32xf32>
    %397 = vector.extract_strided_slice %377 {offsets = [0, 64], sizes = [2, 32], strides = [1, 1]} : vector<2x128xf32> to vector<2x32xf32>
    %398 = vector.extract_strided_slice %380 {offsets = [0, 64], sizes = [2, 32], strides = [1, 1]} : vector<2x128xf32> to vector<2x32xf32>
    %399 = arith.mulf %388, %398 : vector<2x32xf32>
    %400 = arith.addf %397, %399 : vector<2x32xf32>
    %401 = math.tanh %400 : vector<2x32xf32>
    %cst_83 = arith.constant 1.000000e+00 : f32
    %402 = vector.broadcast %cst_83 : f32 to vector<2x32xf32>
    %403 = arith.subf %402, %396 : vector<2x32xf32>
    %404 = arith.mulf %403, %401 : vector<2x32xf32>
    %405 = arith.mulf %396, %375 : vector<2x32xf32>
    %406 = arith.addf %404, %405 : vector<2x32xf32>
    %407 = vector.extract_strided_slice %313 {offsets = [0, 384], sizes = [2, 128], strides = [1, 1]} : vector<2x512xf32> to vector<2x128xf32>
    %408 = arith.addf %407, %59 : vector<2x128xf32>
    %cst_84 = arith.constant dense<0.000000e+00> : vector<2x128xf32>
    %409 = tpu.matmul %406, %69, %cst_84 {dimension_numbers = #tpu.dot_dimension_numbers<[1], [0], [0], [1], [0, 0, 1, 1], [], []>} : vector<2x32xf32>, vector<32x128xf32>, vector<2x128xf32> -> vector<2x128xf32>
    %410 = vector.broadcast %11 : vector<1x128xf32> to vector<2x128xf32>
    %411 = arith.addf %409, %410 : vector<2x128xf32>
    %412 = vector.extract_strided_slice %408 {offsets = [0, 0], sizes = [2, 32], strides = [1, 1]} : vector<2x128xf32> to vector<2x32xf32>
    %413 = vector.extract_strided_slice %411 {offsets = [0, 0], sizes = [2, 32], strides = [1, 1]} : vector<2x128xf32> to vector<2x32xf32>
    %414 = arith.addf %412, %413 : vector<2x32xf32>
    %415 = arith.negf %414 : vector<2x32xf32>
    %416 = math.exp %415 : vector<2x32xf32>
    %cst_85 = arith.constant 1.000000e+00 : f32
    %417 = vector.broadcast %cst_85 : f32 to vector<2x32xf32>
    %418 = arith.addf %417, %416 : vector<2x32xf32>
    %419 = arith.divf %417, %418 : vector<2x32xf32>
    %420 = vector.extract_strided_slice %408 {offsets = [0, 32], sizes = [2, 32], strides = [1, 1]} : vector<2x128xf32> to vector<2x32xf32>
    %421 = vector.extract_strided_slice %411 {offsets = [0, 32], sizes = [2, 32], strides = [1, 1]} : vector<2x128xf32> to vector<2x32xf32>
    %422 = arith.addf %420, %421 : vector<2x32xf32>
    %423 = arith.negf %422 : vector<2x32xf32>
    %424 = math.exp %423 : vector<2x32xf32>
    %cst_86 = arith.constant 1.000000e+00 : f32
    %425 = vector.broadcast %cst_86 : f32 to vector<2x32xf32>
    %426 = arith.addf %425, %424 : vector<2x32xf32>
    %427 = arith.divf %425, %426 : vector<2x32xf32>
    %428 = vector.extract_strided_slice %408 {offsets = [0, 64], sizes = [2, 32], strides = [1, 1]} : vector<2x128xf32> to vector<2x32xf32>
    %429 = vector.extract_strided_slice %411 {offsets = [0, 64], sizes = [2, 32], strides = [1, 1]} : vector<2x128xf32> to vector<2x32xf32>
    %430 = arith.mulf %419, %429 : vector<2x32xf32>
    %431 = arith.addf %428, %430 : vector<2x32xf32>
    %432 = math.tanh %431 : vector<2x32xf32>
    %cst_87 = arith.constant 1.000000e+00 : f32
    %433 = vector.broadcast %cst_87 : f32 to vector<2x32xf32>
    %434 = arith.subf %433, %427 : vector<2x32xf32>
    %435 = arith.mulf %434, %432 : vector<2x32xf32>
    %436 = arith.mulf %427, %406 : vector<2x32xf32>
    %437 = arith.addf %435, %436 : vector<2x32xf32>
    %438 = tpu.concatenate %344, %375, %406, %437 in 1 : vector<2x32xf32>, vector<2x32xf32>, vector<2x32xf32>, vector<2x32xf32> -> vector<2x128xf32>
    %c712 = arith.constant 712 : index
    %c0_88 = arith.constant 0 : index
    %439 = vector.load %arg4[%c712, %c0_88] : memref<848x128xf32, #tpu.memory_space<vmem>>, vector<128x128xf32>
    %cst_89 = arith.constant dense<0.000000e+00> : vector<2x128xf32>
    %440 = tpu.matmul %438, %439, %cst_89 {dimension_numbers = #tpu.dot_dimension_numbers<[1], [0], [0], [1], [0, 0, 1, 1], [], []>} : vector<2x128xf32>, vector<128x128xf32>, vector<2x128xf32> -> vector<2x128xf32>
    %441 = vector.broadcast %12 : vector<1x128xf32> to vector<2x128xf32>
    %442 = arith.addf %440, %441 : vector<2x128xf32>
    %443 = vector.extract_strided_slice %442 {offsets = [0, 0], sizes = [2, 4], strides = [1, 1]} : vector<2x128xf32> to vector<2x4xf32>
    %c0_90 = arith.constant 0 : index
    %c0_91 = arith.constant 0 : index
    %444 = vector.load %arg6[%c0_90, %c0_91] : memref<2x4xf32, #tpu.memory_space<vmem>>, vector<2x4xf32>
    tpu.vector_store %arg6[%c0_90, %c0_91], %443 {strides = array<i32>} : memref<2x4xf32, #tpu.memory_space<vmem>>, vector<2x4xf32>,
    return
  }
  func.func @transform_0(%arg0: i32, %arg1: memref<1xi32, #tpu.memory_space<smem>>) -> (i32, i32, i32, i32) {
    %c0 = arith.constant 0 : index
    %0 = memref.load %arg1[%c0] : memref<1xi32, #tpu.memory_space<smem>>
    %c0_i32 = arith.constant 0 : i32
    %c0_i32_0 = arith.constant 0 : i32
    %c0_i32_1 = arith.constant 0 : i32
    return %arg0, %0, %c0_i32, %c0_i32_0 : i32, i32, i32, i32
  }
  func.func @transform_1(%arg0: i32, %arg1: memref<1xi32, #tpu.memory_space<smem>>) -> (i32, i32) {
    %c0_i32 = arith.constant 0 : i32
    %c0_i32_0 = arith.constant 0 : i32
    return %arg0, %c0_i32 : i32, i32
  }
  func.func @transform_2(%arg0: i32, %arg1: memref<1xi32, #tpu.memory_space<smem>>) -> (i32, i32) {
    %c0_i32 = arith.constant 0 : i32
    %c0_i32_0 = arith.constant 0 : i32
    %c0_i32_1 = arith.constant 0 : i32
    return %c0_i32, %c0_i32_0 : i32, i32
  }
  func.func @transform_3(%arg0: i32, %arg1: memref<1xi32, #tpu.memory_space<smem>>) -> (i32, i32) {
    %c0_i32 = arith.constant 0 : i32
    %c0_i32_0 = arith.constant 0 : i32
    %c0_i32_1 = arith.constant 0 : i32
    return %c0_i32, %c0_i32_0 : i32, i32
  }
  func.func @transform_4(%arg0: i32, %arg1: memref<1xi32, #tpu.memory_space<smem>>) -> (i32, i32) {
    %c0_i32 = arith.constant 0 : i32
    %c0_i32_0 = arith.constant 0 : i32
    return %arg0, %c0_i32 : i32, i32
  }
}

</mosaic_0001>

<bundles_post_ra>
// kernel: _forward_impl.1
= control target key start
LH: loop header
LB: loop body
LE: loop exit
PB: predicated region body
PF: predicated region fallthrough
CT: control target
= control target key end

     0   :  { %11 = vsyncpa [#allocation5], 0  ;;  %s4234_s0 = inlined_call_operand.<no memory space> [shape: s32[1], index: 0, kind: input, shape index: {}]   ;;  %s4235_s1 = inlined_call_operand.hbm [shape: f32[2,4,2,8], index: 1, kind: input, shape index: {}]   ;;  %s4236_s2 = inlined_call_operand.vmem [shape: f32[2,4], index: 2, kind: input, shape index: {}]   ;;  %s4237_s3 = inlined_call_operand.hbm [shape: f32[848,128], index: 3, kind: input, shape index: {}]   ;;  %s4238_s4 = inlined_call_operand.hbm [shape: f32[32,1024], index: 4, kind: input, shape index: {}]   ;;  %s4239_s5 = inlined_call_operand.hbm [shape: f32[2,4], index: 5, kind: output, shape index: {}]  }
   0x1   :  { %12 = vsyncpa [#allocation8], 0 }
   0x2   :  { %13 = vsyncpa [#allocation6], 0  ;;  %s3687_s18 = smov [#allocation7]   ;;  %s2903_s22 = sshll.u32 %s4234_s0, 5 }
   0x3   :  { %s36_s19 = sshll.u32 %s3687_s18, 4  ;;  %s37_s19 = int_to_ptr.vmem [resolvable:$true] %s36_s19 }
   0x4   :  { %s3607_s23 = scalar_lea.vmem %s37_s19, 13568  ;;  %p3612_p1 = scmp.lt.s32.totalorder %s37_s19, %s37_s19 }
   0x5   :  { %p3608_p0 = scmp.ne.s32.totalorder %s37_s19, %s3607_s23  ;;  %p3613_p2 = scmp.lt.s32.totalorder %s3607_s23, %s3607_s23 }
   0x7   :  { %p3614_p3 = por %p3613_p2, %p3612_p1 }
   0x9   :  { %p3615_p4 = pnand %p3614_p3, %p3608_p0 }
   0xb   :  { %3618 = shalt.err (!%p3615_p4)
}
   0xc   :  { %s3688_s24 = smov 128   ;;  %s3689_s25 = smov 8  }
   0xd   :  { %42 = dma.hbm_to_vmem [thread:$0]  %s4237_s3, 13568, %s37_s19, [#allocation8], %s3688_s24, %s3688_s24, %s3689_s25  }
   0xe   :  { %s21_s30 = scalar_lea.hbm %s4235_s1, %s2903_s22  ;;  %s3690_s6 = smov [#allocation4]  }
   0xf   :  { %s22_s7 = sshll.u32 %s3690_s6, 4  ;;  %s3619_s0 = scalar_lea.hbm %s21_s30, 64  ;;  %s23_s7 = int_to_ptr.vmem [resolvable:$true] %s22_s7 }
  0x10   :  { %p3620_p5 = scmp.ne.s32.totalorder %s21_s30, %s3619_s0  ;;  %s3621_s10 = scalar_lea.hbm %s4235_s1, 256 }
  0x11   :  { %p3622_p6 = scmp.lt.s32.totalorder %s21_s30, %s4235_s1  ;;  %p3623_p7 = scmp.lt.s32.totalorder %s3621_s10, %s3619_s0 }
  0x13   :  { %p3624_p8 = por %p3623_p7, %p3622_p6 }
  0x15   :  { %p3625_p9 = pnand %p3624_p8, %p3620_p5 }
  0x17   :  { %3628 = shalt.err (!%p3625_p9)
}
  0x18   :  { %s3629_s3 = scalar_lea.vmem %s23_s7, 64  ;;  %p3634_p11 = scmp.lt.s32.totalorder %s23_s7, %s23_s7 }
  0x19   :  { %p3630_p10 = scmp.ne.s32.totalorder %s23_s7, %s3629_s3  ;;  %p3635_p12 = scmp.lt.s32.totalorder %s3629_s3, %s3629_s3 }
  0x1b   :  { %p3636_p13 = por %p3635_p12, %p3634_p11 }
  0x1d   :  { %p3637_p0 = pnand %p3636_p13, %p3630_p10 }
  0x1f   :  { %3640 = shalt.err (!%p3637_p0)
}
  0x20   :  { %s3691_s13 = smov 32   ;;  %s3692_s14 = smov 2  }
  0x21   :  { %28 = dma.hbm_to_vmem [thread:$0]  %s21_s30, 64, %s23_s7, [#allocation5], %s3688_s24, %s3691_s13, %s3692_s14  }
  0x22   :  { %s3693_s15 = smov [#allocation9]  }
  0x23   :  { %s48_s16 = sshll.u32 %s3693_s15, 4  ;;  %s49_s16 = int_to_ptr.vmem [resolvable:$true] %s48_s16 }
  0x24   :  { %s3649_s17 = scalar_lea.vmem %s49_s16, 4096  ;;  %p3654_p2 = scmp.lt.s32.totalorder %s49_s16, %s49_s16 }
  0x25   :  { %p3650_p1 = scmp.ne.s32.totalorder %s49_s16, %s3649_s17  ;;  %p3655_p3 = scmp.lt.s32.totalorder %s3649_s17, %s3649_s17 }
  0x27   :  { %p3656_p4 = por %p3655_p3, %p3654_p2 }
  0x29   :  { %p3657_p5 = pnand %p3656_p4, %p3650_p1 }
  0x2b   :  { %3660 = shalt.err (!%p3657_p5)
}
  0x2c   :  { %s3694_s1 = smov 1024   ;;  %s3695_s18 = smov 64  }
  0x2d   :  { %54 = dma.hbm_to_vmem [thread:$0]  %s4238_s4, 4096, %s49_s16, [#allocation8], %s3694_s1, %s3694_s1, %s3695_s18  }
  0x2e   :  { %3681 = dma.done.wait [#allocation5], 64  }
  0x2f   :  { %3682 = vsyncadd [#allocation5], 4294967232 }
  0x30   :  { %3683 = dma.done.wait [#allocation8], 17664  }
  0x31   :  { %3684 = vsyncadd [#allocation8], 4294949632  ;;  %v3696_v0 = vmov 0.0   ;;  %vm3697_vm0 = vmmov 0   ;;  %v68_v1 = vld [vmem:[#allocation7] sm:$0xff]  ;;  %vm92_vm1 = vcmask 1041409   ;;  %v85_v24 = vlaneseq }
  0x32   :  { %3126 = vmatprep.subr.mxu0 %v3696_v0  ;;  %3131 = vmatprep.subr.mxu1 %v3696_v0  ;;  %v65_v2 = vld [vmem:[#allocation4] sm:$0x3]  ;;  %v66_v3 = vld [vmem:[#allocation4 + $0x2] sm:$0x3]  ;;  %vm94_vm2 = vcmask 64512   ;;  %v84_v6 = vld [vmem:[#allocation7 + $0x80] sm:$0xff] }
  0x33   :  { %3128 = vmatprep.mubr.msk.f32.mxu0 %vm3697_vm0, %v3696_v0  ;;  %3133 = vmatprep.mubr.msk.f32.mxu1 %vm3697_vm0, %v3696_v0  ;;  %v91_v4 = vrot.slane %v66_v3, 7  ;;  %v170_v5 = vrot.slane %v65_v2, 1  ;;  %v83_v9 = vld [vmem:[#allocation7 + $0x78] sm:$0xff]  ;;  %v82_v10 = vld [vmem:[#allocation7 + $0x70] sm:$0xff]  ;;  %v81_v11 = vld [vmem:[#allocation7 + $0x68] sm:$0xff]  ;;  %v3802_v25 = vshrl.u32 %v85_v24, 7 }
  0x34   :  { %3127 = vmatpush3.msra.mxu0 %v68_v1  ;;  %3132 = vmatpush3.msra.mxu1 %v68_v1  ;;  %v80_v12 = vld [vmem:[#allocation7 + $0x60] sm:$0xff]  ;;  %v79_v13 = vld [vmem:[#allocation7 + $0x58] sm:$0xff]  ;;  %v78_v14 = vld [vmem:[#allocation7 + $0x50] sm:$0xff]  ;;  %s3698_s4 = smov 96   ;;  %vm1397_vm7 = vcmask 261120   ;;  %vm2213_vm8 = vcmask 1043456  }
  0x35   :  { %3136 = vmatprep.subr.mxu0 %v3696_v0  ;;  %3171 = vmatprep.subr.mxu1 %v3696_v0  ;;  %v3758_v7 = vsel %vm92_vm1, %v91_v4, %v65_v2  ;;  %v3760_v8 = vsel %vm92_vm1, %v66_v3, %v170_v5  ;;  %v77_v15 = vld [vmem:[#allocation7 + $0x48] sm:$0xff]  ;;  %v76_v16 = vld [vmem:[#allocation7 + $0x40] sm:$0xff]  ;;  %v75_v17 = vld [vmem:[#allocation7 + $0x38] sm:$0xff]  ;;  %v87_v26 = vsub.s32 0, %v3802_v25  ;;  %vm2209_vm9 = vcmask 31744  }
  0x36   :  { %3129 = vmatmul.mubr.msk.f32.vlgmr.msra.gmra.mxu0 %vm94_vm2, %v3758_v7  ;;  %3134 = vmatmul.mubr.msk.f32.vlgmr.msra.gmra.mxu1 %vm94_vm2, %v3760_v8  ;;  %v74_v18 = vld [vmem:[#allocation7 + $0x30] sm:$0xff]  ;;  %v73_v19 = vld [vmem:[#allocation7 + $0x28] sm:$0xff]  ;;  %v72_v20 = vld [vmem:[#allocation7 + $0x20] sm:$0xff]  ;;  %vm2789_vm10 = vcmask 523264   ;;  %vm2791_vm11 = vcmask 785408   ;;  %vm2883_vm12 = vcmask 25600  }
  0x37   :  { %3137 = vmatpush3.msra.mxu0 %v84_v6  ;;  %3172 = vmatpush3.msra.mxu1 %v84_v6  ;;  %v71_v21 = vld [vmem:[#allocation7 + $0x18] sm:$0xff]  ;;  %v70_v22 = vld [vmem:[#allocation7 + $0x10] sm:$0xff]  ;;  %v69_v23 = vld [vmem:[#allocation7 + $0x8] sm:$0xff] }
  0x38   :  { %3138 = vmatprep.subr.mxu0 %v3696_v0  ;;  %3173 = vmatprep.subr.mxu1 %v3696_v0  ;;  %v3805_v27 = vld [vmem:[#allocation7 + $0x348] sm:$0xff]  ;;  %v428_v37 = vld [vmem:[#allocation7 + $0x180] sm:$0xff]  ;;  %v427_v41 = vld [vmem:[#allocation7 + $0x178] sm:$0xff] }
  0x39   :  { %3139 = vmatpush3.msra.mxu0 %v83_v9  ;;  %3174 = vmatpush3.msra.mxu1 %v83_v9  ;;  %v88_v28 = vrot.slane %v3805_v27, %v87_v26  ;;  %v412_v38 = vld [vmem:[#allocation7 + $0x100] sm:$0xff]  ;;  %v411_v42 = vld [vmem:[#allocation7 + $0xf8] sm:$0xff]  ;;  %v426_v43 = vld [vmem:[#allocation7 + $0x170] sm:$0xff] }
  0x3a   :  { %3140 = vmatprep.subr.mxu0 %v3696_v0  ;;  %3175 = vmatprep.subr.mxu1 %v3696_v0  ;;  %v410_v44 = vld [vmem:[#allocation7 + $0xf0] sm:$0xff]  ;;  %v425_v45 = vld [vmem:[#allocation7 + $0x168] sm:$0xff]  ;;  %v424_v47 = vld [vmem:[#allocation7 + $0x160] sm:$0xff] }
  0x3b   :  { %3141 = vmatpush3.msra.mxu0 %v82_v10  ;;  %3176 = vmatpush3.msra.mxu1 %v82_v10  ;;  %v409_v46 = vld [vmem:[#allocation7 + $0xe8] sm:$0xff]  ;;  %v408_v48 = vld [vmem:[#allocation7 + $0xe0] sm:$0xff]  ;;  %v423_v49 = vld [vmem:[#allocation7 + $0x158] sm:$0xff] }
  0x3c   :  { %3142 = vmatprep.subr.mxu0 %v3696_v0  ;;  %3177 = vmatprep.subr.mxu1 %v3696_v0  ;;  %v407_v50 = vld [vmem:[#allocation7 + $0xd8] sm:$0xff]  ;;  %v422_v51 = vld [vmem:[#allocation7 + $0x150] sm:$0xff]  ;;  %v421_v53 = vld [vmem:[#allocation7 + $0x148] sm:$0xff] }
  0x3d   :  { %3143 = vmatpush3.msra.mxu0 %v81_v11  ;;  %3178 = vmatpush3.msra.mxu1 %v81_v11  ;;  %v406_v52 = vld [vmem:[#allocation7 + $0xd0] sm:$0xff]  ;;  %v405_v54 = vld [vmem:[#allocation7 + $0xc8] sm:$0xff]  ;;  %v420_v55 = vld [vmem:[#allocation7 + $0x140] sm:$0xff] }
  0x3e   :  { %3144 = vmatprep.subr.mxu0 %v3696_v0  ;;  %3179 = vmatprep.subr.mxu1 %v3696_v0  ;;  %v404_v56 = vld [vmem:[#allocation7 + $0xc0] sm:$0xff]  ;;  %v419_v57 = vld [vmem:[#allocation7 + $0x138] sm:$0xff]  ;;  %v418_v59 = vld [vmem:[#allocation7 + $0x130] sm:$0xff] }
  0x3f   :  { %3145 = vmatpush3.msra.mxu0 %v80_v12  ;;  %3180 = vmatpush3.msra.mxu1 %v80_v12  ;;  %v403_v58 = vld [vmem:[#allocation7 + $0xb8] sm:$0xff]  ;;  %v402_v60 = vld [vmem:[#allocation7 + $0xb0] sm:$0xff]  ;;  %v417_v61 = vld [vmem:[#allocation7 + $0x128] sm:$0xff] }
  0x40   :  { %3146 = vmatprep.subr.mxu0 %v3696_v0  ;;  %3181 = vmatprep.subr.mxu1 %v3696_v0  ;;  %v401_v62 = vld [vmem:[#allocation7 + $0xa8] sm:$0xff]  ;;  %v416_v63 = vld [vmem:[#allocation7 + $0x120] sm:$0xff]  ;;  %v415_v2 = vld [vmem:[#allocation7 + $0x118] sm:$0xff] }
  0x41   :  { %3147 = vmatpush3.msra.mxu0 %v79_v13  ;;  %3182 = vmatpush3.msra.mxu1 %v79_v13  ;;  %v400_v1 = vld [vmem:[#allocation7 + $0xa0] sm:$0xff]  ;;  %v399_v3 = vld [vmem:[#allocation7 + $0x98] sm:$0xff]  ;;  %v414_v4 = vld [vmem:[#allocation7 + $0x110] sm:$0xff] }
  0x42   :  { %3148 = vmatprep.subr.mxu0 %v3696_v0  ;;  %3183 = vmatprep.subr.mxu1 %v3696_v0  ;;  %v398_v5 = vld [vmem:[#allocation7 + $0x90] sm:$0xff]  ;;  %v413_v6 = vld [vmem:[#allocation7 + $0x108] sm:$0xff]  ;;  %v671_v10 = vld [vmem:[#allocation7 + $0x280] sm:$0xff] }
  0x43   :  { %3149 = vmatpush3.msra.mxu0 %v78_v14  ;;  %3184 = vmatpush3.msra.mxu1 %v78_v14  ;;  %v397_v9 = vld [vmem:[#allocation7 + $0x88] sm:$0xff]  ;;  %v584_v11 = vld [vmem:[#allocation7 + $0x200] sm:$0xff]  ;;  %v670_v12 = vld [vmem:[#allocation7 + $0x278] sm:$0xff] }
  0x44   :  { %3150 = vmatprep.subr.mxu0 %v3696_v0  ;;  %3185 = vmatprep.subr.mxu1 %v3696_v0  ;;  %v583_v13 = vld [vmem:[#allocation7 + $0x1f8] sm:$0xff]  ;;  %v669_v14 = vld [vmem:[#allocation7 + $0x270] sm:$0xff]  ;;  %v664_v24 = vld [vmem:[#allocation7 + $0x248] sm:$0xff] }
  0x45   :  { %3151 = vmatpush3.msra.mxu0 %v77_v15  ;;  %3186 = vmatpush3.msra.mxu1 %v77_v15  ;;  %v582_v15 = vld [vmem:[#allocation7 + $0x1f0] sm:$0xff] }
  0x46   :  { %3152 = vmatprep.subr.mxu0 %v3696_v0  ;;  %3187 = vmatprep.subr.mxu1 %v3696_v0 }
  0x47   :  { %3153 = vmatpush3.msra.mxu0 %v76_v16  ;;  %3188 = vmatpush3.msra.mxu1 %v76_v16  ;;  %v668_v16 = vld [vmem:[#allocation7 + $0x268] sm:$0xff] }
  0x48   :  { %3154 = vmatprep.subr.mxu0 %v3696_v0  ;;  %3189 = vmatprep.subr.mxu1 %v3696_v0 }
  0x49   :  { %3155 = vmatpush3.msra.mxu0 %v75_v17  ;;  %3190 = vmatpush3.msra.mxu1 %v75_v17  ;;  %v581_v17 = vld [vmem:[#allocation7 + $0x1e8] sm:$0xff] }
  0x4a   :  { %3156 = vmatprep.subr.mxu0 %v3696_v0  ;;  %3191 = vmatprep.subr.mxu1 %v3696_v0 }
  0x4b   :  { %3157 = vmatpush3.msra.mxu0 %v74_v18  ;;  %3192 = vmatpush3.msra.mxu1 %v74_v18  ;;  %v667_v18 = vld [vmem:[#allocation7 + $0x260] sm:$0xff] }
  0x4c   :  { %3158 = vmatprep.subr.mxu0 %v3696_v0  ;;  %3193 = vmatprep.subr.mxu1 %v3696_v0 }
  0x4d   :  { %3159 = vmatpush3.msra.mxu0 %v73_v19  ;;  %3194 = vmatpush3.msra.mxu1 %v73_v19  ;;  %v580_v19 = vld [vmem:[#allocation7 + $0x1e0] sm:$0xff] }
  0x4e   :  { %3160 = vmatprep.subr.mxu0 %v3696_v0  ;;  %3195 = vmatprep.subr.mxu1 %v3696_v0 }
  0x4f   :  { %3161 = vmatpush3.msra.mxu0 %v72_v20  ;;  %3196 = vmatpush3.msra.mxu1 %v72_v20  ;;  %v666_v20 = vld [vmem:[#allocation7 + $0x258] sm:$0xff] }
  0x50   :  { %3162 = vmatprep.subr.mxu0 %v3696_v0  ;;  %3197 = vmatprep.subr.mxu1 %v3696_v0 }
  0x51   :  { %3168 = vmatprep.mubr.msk.f32.mxu0 %vm3697_vm0, %v3696_v0  ;;  %3203 = vmatprep.mubr.msk.f32.mxu1 %vm3697_vm0, %v3696_v0 }
  0x52   :  { %3163 = vmatpush3.msra.mxu0 %v71_v21  ;;  %3198 = vmatpush3.msra.mxu1 %v71_v21  ;;  %v579_v21 = vld [vmem:[#allocation7 + $0x1d8] sm:$0xff] }
  0x53   :  { %3164 = vmatprep.subr.mxu0 %v3696_v0  ;;  %3199 = vmatprep.subr.mxu1 %v3696_v0 }
  0x54   :  { %3165 = vmatpush3.msra.mxu0 %v70_v22  ;;  %3200 = vmatpush3.msra.mxu1 %v70_v22  ;;  %v665_v22 = vld [vmem:[#allocation7 + $0x250] sm:$0xff] }
  0x55   :  { %3166 = vmatprep.subr.mxu0 %v3696_v0  ;;  %3201 = vmatprep.subr.mxu1 %v3696_v0 }
  0x56   :  { %3167 = vmatpush3.msra.mxu0 %v69_v23  ;;  %3202 = vmatpush3.msra.mxu1 %v69_v23  ;;  %v578_v23 = vld [vmem:[#allocation7 + $0x1d0] sm:$0xff] }
  0x57   :  { %3206 = vmatprep.subr.mxu0 %v3696_v0  ;;  %3241 = vmatprep.subr.mxu1 %v3696_v0 }
  0xf6   :  { %v163_v29 = vpop.f32.mrf.mxu0  ;;  %v240_v30 = vpop.f32.mrf.mxu1 }
  0xf7   :  { %v164_v31 = vadd.f32 %v163_v29, %v88_v28  ;;  %v241_v32 = vadd.f32 %v240_v30, %v88_v28  ;;  %v577_v28 = vld [vmem:[#allocation7 + $0x1c8] sm:$0xff]  ;;  %v663_v29 = vld [vmem:[#allocation7 + $0x240] sm:$0xff] }
  0xf8   :  { %v3135_v33 = vpop.f32.mrf.mxu1  ;;  %v3130_v34 = vpop.f32.mrf.mxu0  ;;  %v576_v30 = vld [vmem:[#allocation7 + $0x1c0] sm:$0xff] }
  0xf9   :  { %vm167_vm3 = vcmp.gt.f32.partialorder %v164_v31, 0.0  ;;  %v168_v35 = vmul.f32 0.01, %v164_v31  ;;  %vm244_vm4 = vcmp.gt.f32.partialorder %v241_v32, 0.0  ;;  %v245_v36 = vmul.f32 0.01, %v241_v32 }
  0xfa   :  { %v661_v33 = vld [vmem:[#allocation7 + $0x230] sm:$0xff] }
  0xfb   :  { %v3810_v39 = vsel %vm167_vm3, %v164_v31, %v168_v35  ;;  %v3812_v40 = vsel %vm244_vm4, %v241_v32, %v245_v36  ;;  %v662_v31 = vld [vmem:[#allocation7 + $0x238] sm:$0xff]  ;;  %v574_v34 = vld [vmem:[#allocation7 + $0x1b0] sm:$0xff]  ;;  %v660_v35 = vld [vmem:[#allocation7 + $0x228] sm:$0xff] }
  0xfc   :  { %3169 = vmatmul.mubr.f32.vlgmr.msra.gmra.mxu0 %v3810_v39  ;;  %3204 = vmatmul.mubr.f32.vlgmr.msra.gmra.mxu1 %v3812_v40  ;;  %v575_v32 = vld [vmem:[#allocation7 + $0x1b8] sm:$0xff]  ;;  %v573_v36 = vld [vmem:[#allocation7 + $0x1a8] sm:$0xff] }
  0xfd   :  { %3207 = vmatpush3.msra.mxu0 %v428_v37  ;;  %3242 = vmatpush3.msra.mxu1 %v412_v38  ;;  %v659_v37 = vld [vmem:[#allocation7 + $0x220] sm:$0xff] }
  0xfe   :  { %3208 = vmatprep.subr.mxu0 %v3696_v0  ;;  %3243 = vmatprep.subr.mxu1 %v3696_v0  ;;  %v572_v38 = vld [vmem:[#allocation7 + $0x1a0] sm:$0xff] }
  0xff   :  { %3209 = vmatpush3.msra.mxu0 %v427_v41  ;;  %3244 = vmatpush3.msra.mxu1 %v411_v42  ;;  %v657_v41 = vld [vmem:[#allocation7 + $0x210] sm:$0xff] }
 0x100   :  { %3210 = vmatprep.subr.mxu0 %v3696_v0  ;;  %3245 = vmatprep.subr.mxu1 %v3696_v0  ;;  %v570_v42 = vld [vmem:[#allocation7 + $0x190] sm:$0xff] }
 0x101   :  { %3211 = vmatpush3.msra.mxu0 %v426_v43  ;;  %3246 = vmatpush3.msra.mxu1 %v410_v44  ;;  %v656_v43 = vld [vmem:[#allocation7 + $0x208] sm:$0xff] }
 0x102   :  { %3212 = vmatprep.subr.mxu0 %v3696_v0  ;;  %3247 = vmatprep.subr.mxu1 %v3696_v0  ;;  %v569_v44 = vld [vmem:[#allocation7 + $0x188] sm:$0xff] }
 0x103   :  { %3213 = vmatpush3.msra.mxu0 %v425_v45  ;;  %3248 = vmatpush3.msra.mxu1 %v409_v46  ;;  %v759_v45 = vld [vmem:[#allocation9 + $0x58] sm:$0xff]  ;;  %v757_v46 = vld [vmem:[#allocation9 + $0x48] sm:$0xff] }
 0x104   :  { %3214 = vmatprep.subr.mxu0 %v3696_v0  ;;  %3249 = vmatprep.subr.mxu1 %v3696_v0 }
 0x105   :  { %3215 = vmatpush3.msra.mxu0 %v424_v47  ;;  %3250 = vmatpush3.msra.mxu1 %v408_v48  ;;  %v249_v47 = vsub.s32 1, %v3802_v25 }
 0x106   :  { %3216 = vmatprep.subr.mxu0 %v3696_v0  ;;  %3251 = vmatprep.subr.mxu1 %v3696_v0 }
 0x107   :  { %3217 = vmatpush3.msra.mxu0 %v423_v49  ;;  %3252 = vmatpush3.msra.mxu1 %v407_v50  ;;  %v250_v48 = vrot.slane %v3805_v27, %v249_v47 }
 0x108   :  { %3218 = vmatprep.subr.mxu0 %v3696_v0  ;;  %3253 = vmatprep.subr.mxu1 %v3696_v0 }
 0x109   :  { %3219 = vmatpush3.msra.mxu0 %v422_v51  ;;  %3254 = vmatpush3.msra.mxu1 %v406_v52 }
 0x10a   :  { %3220 = vmatprep.subr.mxu0 %v3696_v0  ;;  %3255 = vmatprep.subr.mxu1 %v3696_v0 }
 0x10b   :  { %3221 = vmatpush3.msra.mxu0 %v421_v53  ;;  %3256 = vmatpush3.msra.mxu1 %v405_v54 }
 0x10c   :  { %3222 = vmatprep.subr.mxu0 %v3696_v0  ;;  %3257 = vmatprep.subr.mxu1 %v3696_v0 }
 0x10d   :  { %3223 = vmatpush3.msra.mxu0 %v420_v55  ;;  %3258 = vmatpush3.msra.mxu1 %v404_v56 }
 0x10e   :  { %3224 = vmatprep.subr.mxu0 %v3696_v0  ;;  %3259 = vmatprep.subr.mxu1 %v3696_v0 }
 0x10f   :  { %3225 = vmatpush3.msra.mxu0 %v419_v57  ;;  %3260 = vmatpush3.msra.mxu1 %v403_v58  ;;  %v758_v57 = vld [vmem:[#allocation9 + $0x50] sm:$0xff] }
 0x110   :  { %3226 = vmatprep.subr.mxu0 %v3696_v0  ;;  %3261 = vmatprep.subr.mxu1 %v3696_v0 }
 0x111   :  { %3227 = vmatpush3.msra.mxu0 %v418_v59  ;;  %3262 = vmatpush3.msra.mxu1 %v402_v60  ;;  %v763_v60 = vld [vmem:[#allocation9 + $0x78] sm:$0xff] }
 0x112   :  { %3228 = vmatprep.subr.mxu0 %v3696_v0  ;;  %3263 = vmatprep.subr.mxu1 %v3696_v0 }
 0x113   :  { %3229 = vmatpush3.msra.mxu0 %v417_v61  ;;  %3264 = vmatpush3.msra.mxu1 %v401_v62  ;;  %v756_v61 = vld [vmem:[#allocation9 + $0x40] sm:$0xff]  ;;  %v761_v62 = vld [vmem:[#allocation9 + $0x68] sm:$0xff] }
 0x114   :  { %3230 = vmatprep.subr.mxu0 %v3696_v0  ;;  %3265 = vmatprep.subr.mxu1 %v3696_v0 }
 0x115   :  { %3231 = vmatpush3.msra.mxu0 %v416_v63  ;;  %3266 = vmatpush3.msra.mxu1 %v400_v1  ;;  %v762_v63 = vld [vmem:[#allocation9 + $0x70] sm:$0xff]  ;;  %v751_v1 = vld [vmem:[#allocation9 + $0x18] sm:$0xff] }
 0x116   :  { %3232 = vmatprep.subr.mxu0 %v3696_v0  ;;  %3267 = vmatprep.subr.mxu1 %v3696_v0 }
 0x117   :  { %3233 = vmatpush3.msra.mxu0 %v415_v2  ;;  %3268 = vmatpush3.msra.mxu1 %v399_v3  ;;  %v760_v2 = vld [vmem:[#allocation9 + $0x60] sm:$0xff]  ;;  %v749_v3 = vld [vmem:[#allocation9 + $0x8] sm:$0xff] }
 0x118   :  { %3234 = vmatprep.subr.mxu0 %v3696_v0  ;;  %3269 = vmatprep.subr.mxu1 %v3696_v0 }
 0x119   :  { %3235 = vmatpush3.msra.mxu0 %v414_v4  ;;  %3270 = vmatpush3.msra.mxu1 %v398_v5  ;;  %v750_v4 = vld [vmem:[#allocation9 + $0x10] sm:$0xff]  ;;  %v755_v5 = vld [vmem:[#allocation9 + $0x38] sm:$0xff] }
 0x11a   :  { %3236 = vmatprep.subr.mxu0 %v3696_v0  ;;  %3271 = vmatprep.subr.mxu1 %v3696_v0 }
 0x11b   :  { %3237 = vmatpush3.msra.mxu0 %v413_v6  ;;  %3238 = vmatprep.mubr.msk.f32.mxu0 %vm3697_vm0, %v3696_v0  ;;  %v748_v6 = vld [vmem:[#allocation9] sm:$0xff] }
 0x11c   :  { %3272 = vmatpush3.msra.mxu1 %v397_v9  ;;  %3273 = vmatprep.mubr.msk.f32.mxu1 %vm3697_vm0, %v3696_v0  ;;  %v753_v9 = vld [vmem:[#allocation9 + $0x28] sm:$0xff] }
 0x11d   :  { %3239 = vmatmul.mubr.f32.vlgmr.msra.gmra.mxu0 %v3812_v40  ;;  %3274 = vmatmul.mubr.f32.vlgmr.msra.gmra.mxu1 %v3810_v39  ;;  %v658_v39 = vld [vmem:[#allocation7 + $0x218] sm:$0xff] }
 0x11e   :  { %3311 = vmatprep.subr.mxu1 %v3696_v0  ;;  %3276 = vmatprep.subr.mxu0 %v3696_v0  ;;  %v571_v40 = vld [vmem:[#allocation7 + $0x198] sm:$0xff] }
 0x11f   :  { %3312 = vmatpush3.msra.mxu1 %v671_v10  ;;  %3277 = vmatpush3.msra.mxu0 %v584_v11  ;;  %v754_v10 = vld [vmem:[#allocation9 + $0x30] sm:$0xff]  ;;  %v752_v11 = vld [vmem:[#allocation9 + $0x20] sm:$0xff] }
 0x120   :  { %3313 = vmatprep.subr.mxu1 %v3696_v0  ;;  %3278 = vmatprep.subr.mxu0 %v3696_v0 }
 0x121   :  { %3314 = vmatpush3.msra.mxu1 %v670_v12  ;;  %3279 = vmatpush3.msra.mxu0 %v583_v13  ;;  %v3918_v12 = vld [vmem:[#allocation7 + $0x298] sm:$0xff]  ;;  %v3926_v13 = vld [vmem:[#allocation7 + $0x290] sm:$0xff] }
 0x122   :  { %3315 = vmatprep.subr.mxu1 %v3696_v0  ;;  %3280 = vmatprep.subr.mxu0 %v3696_v0 }
 0x123   :  { %3316 = vmatpush3.msra.mxu1 %v669_v14  ;;  %3281 = vmatpush3.msra.mxu0 %v582_v15  ;;  %v3932_v14 = vld [vmem:[#allocation7 + $0x288] sm:$0xff] }
 0x124   :  { %3317 = vmatprep.subr.mxu1 %v3696_v0  ;;  %3282 = vmatprep.subr.mxu0 %v3696_v0 }
 0x125   :  { %3318 = vmatpush3.msra.mxu1 %v668_v16  ;;  %3283 = vmatpush3.msra.mxu0 %v581_v17 }
 0x126   :  { %3319 = vmatprep.subr.mxu1 %v3696_v0  ;;  %3284 = vmatprep.subr.mxu0 %v3696_v0 }
 0x127   :  { %3320 = vmatpush3.msra.mxu1 %v667_v18  ;;  %3285 = vmatpush3.msra.mxu0 %v580_v19  ;;  %v765_v19 = vld [vmem:[#allocation9 + $0x80] ss:$8 sm:$0xf] }
 0x128   :  { %3321 = vmatprep.subr.mxu1 %v3696_v0  ;;  %3286 = vmatprep.subr.mxu0 %v3696_v0 }
 0x129   :  { %3322 = vmatpush3.msra.mxu1 %v666_v20  ;;  %3287 = vmatpush3.msra.mxu0 %v579_v21  ;;  %v766_v20 = vld [vmem:[#allocation9 + $0x80] ss:$8 sm:$0xf0] }
 0x12a   :  { %3323 = vmatprep.subr.mxu1 %v3696_v0  ;;  %3288 = vmatprep.subr.mxu0 %v3696_v0  ;;  %v767_v21 = vor.u32 %v766_v20, %v765_v19 }
 0x12b   :  { %3324 = vmatpush3.msra.mxu1 %v665_v22  ;;  %3289 = vmatpush3.msra.mxu0 %v578_v23  ;;  %v1347_v22 = vsub.s32 2, %v3802_v25 }
 0x12c   :  { %3325 = vmatprep.subr.mxu1 %v3696_v0  ;;  %3290 = vmatprep.subr.mxu0 %v3696_v0 }
 0x12d   :  { %3326 = vmatpush3.msra.mxu1 %v664_v24  ;;  %3291 = vmatpush3.msra.mxu0 %v577_v28  ;;  %v1348_v23 = vrot.slane %v767_v21, %v1347_v22  ;;  %v745_v24 = vsub.s32 3, %v3802_v25 }
 0x12e   :  { %3327 = vmatprep.subr.mxu1 %v3696_v0  ;;  %3292 = vmatprep.subr.mxu0 %v3696_v0 }
 0x12f   :  { %3328 = vmatpush3.msra.mxu1 %v663_v29  ;;  %3293 = vmatpush3.msra.mxu0 %v576_v30 }
 0x130   :  { %3329 = vmatprep.subr.mxu1 %v3696_v0  ;;  %3294 = vmatprep.subr.mxu0 %v3696_v0 }
 0x131   :  { %3330 = vmatpush3.msra.mxu1 %v662_v31  ;;  %3295 = vmatpush3.msra.mxu0 %v575_v32  ;;  %v746_v31 = vrot.slane %v3805_v27, %v745_v24 }
 0x132   :  { %3331 = vmatprep.subr.mxu1 %v3696_v0  ;;  %3296 = vmatprep.subr.mxu0 %v3696_v0 }
 0x133   :  { %3332 = vmatpush3.msra.mxu1 %v661_v33  ;;  %3297 = vmatpush3.msra.mxu0 %v574_v34 }
 0x134   :  { %3333 = vmatprep.subr.mxu1 %v3696_v0  ;;  %3298 = vmatprep.subr.mxu0 %v3696_v0 }
 0x135   :  { %3334 = vmatpush3.msra.mxu1 %v660_v35  ;;  %3299 = vmatpush3.msra.mxu0 %v573_v36 }
 0x136   :  { %3335 = vmatprep.subr.mxu1 %v3696_v0  ;;  %3300 = vmatprep.subr.mxu0 %v3696_v0 }
 0x137   :  { %3336 = vmatpush3.msra.mxu1 %v659_v37  ;;  %3301 = vmatpush3.msra.mxu0 %v572_v38 }
 0x138   :  { %3337 = vmatprep.subr.mxu1 %v3696_v0  ;;  %3302 = vmatprep.subr.mxu0 %v3696_v0 }
 0x139   :  { %3308 = vmatprep.mubr.msk.f32.mxu0 %vm3697_vm0, %v3696_v0  ;;  %3343 = vmatprep.mubr.msk.f32.mxu1 %vm3697_vm0, %v3696_v0 }
 0x13a   :  { %3338 = vmatpush3.msra.mxu1 %v658_v39  ;;  %3303 = vmatpush3.msra.mxu0 %v571_v40 }
 0x13b   :  { %3339 = vmatprep.subr.mxu1 %v3696_v0  ;;  %3304 = vmatprep.subr.mxu0 %v3696_v0 }
 0x13c   :  { %3340 = vmatpush3.msra.mxu1 %v657_v41  ;;  %3305 = vmatpush3.msra.mxu0 %v570_v42 }
 0x13d   :  { %3341 = vmatprep.subr.mxu1 %v3696_v0  ;;  %3306 = vmatprep.subr.mxu0 %v3696_v0 }
 0x13e   :  { %3342 = vmatpush3.msra.mxu1 %v656_v43  ;;  %3307 = vmatpush3.msra.mxu0 %v569_v44  ;;  %v1363_v43 = vsub.s32 6, %v3802_v25 }
 0x13f   :  { %869 = vmatprep.subr.mxu1 %v759_v45  ;;  %798 = vmatprep.subr.mxu0 %v757_v46  ;;  %v1355_v45 = vsub.s32 4, %v3802_v25 }
 0x1bc   :  { %v317_v49 = vpop.f32.mrf.mxu0  ;;  %v390_v50 = vpop.f32.mrf.mxu1 }
 0x1bd   :  { %v318_v51 = vadd.f32 %v317_v49, %v250_v48  ;;  %v391_v52 = vadd.f32 %v390_v50, %v250_v48  ;;  %v1367_v48 = vsub.s32 7, %v3802_v25  ;;  %v1359_v50 = vsub.s32 5, %v3802_v25 }
 0x1be   :  { %v3205_v53 = vpop.f32.mrf.mxu1  ;;  %v3170_v54 = vpop.f32.mrf.mxu0 }
 0x1bf   :  { %vm321_vm5 = vcmp.gt.f32.partialorder %v318_v51, 0.0  ;;  %v322_v55 = vmul.f32 0.01, %v318_v51  ;;  %vm394_vm6 = vcmp.gt.f32.partialorder %v391_v52, 0.0  ;;  %v395_v56 = vmul.f32 0.01, %v391_v52 }
 0x1c0   :  { %v1344_v53 = vrot.slane %v767_v21, %v249_v47 }
 0x1c1   :  { %v323_v58 = vsel %vm321_vm5, %v318_v51, %v322_v55  ;;  %v396_v59 = vsel %vm394_vm6, %v391_v52, %v395_v56  ;;  %v1352_v52 = vrot.slane %v767_v21, %v745_v24  ;;  %v1364_v55 = vrot.slane %v767_v21, %v1363_v43 }
 0x1c2   :  { %3309 = vmatmul.mubr.f32.vlgmr.msra.gmra.mxu0 %v323_v58  ;;  %3344 = vmatmul.mubr.f32.vlgmr.msra.gmra.mxu1 %v396_v59  ;;  %v1340_v24 = vrot.slane %v767_v21, %v87_v26 }
 0x1c3   :  { %870 = vmatpush1.msra.mxu1 %v758_v57  ;;  %903 = vmatprep.mubr.f32.mxu1 %v3696_v0 }
 0x1c4   :  { %1011 = vmatprep.subr.mxu1 %v763_v60  ;;  %799 = vmatpush1.msra.mxu0 %v756_v61  ;;  %v1356_v60 = vrot.slane %v767_v21, %v1355_v45 }
 0x1c5   :  { %832 = vmatprep.mubr.f32.mxu0 %v3696_v0  ;;  %940 = vmatprep.subr.mxu0 %v761_v62  ;;  %v1368_v62 = vrot.slane %v767_v21, %v1367_v48 }
 0x1c6   :  { %2907 = vmatmul.mubr.msk.f32.vlgmr.msra.gmra.mxu1 %vm94_vm2, %v3760_v8  ;;  %2906 = vmatmul.mubr.msk.f32.vlgmr.msra.gmra.mxu0 %vm94_vm2, %v3760_v8 }
 0x1c7   :  { %1012 = vmatpush1.msra.mxu1 %v762_v63  ;;  %1045 = vmatprep.mubr.f32.mxu1 %v3696_v0 }
 0x1c8   :  { %1153 = vmatprep.subr.mxu1 %v751_v1  ;;  %941 = vmatpush1.msra.mxu0 %v760_v2  ;;  %v1360_v1 = vrot.slane %v767_v21, %v1359_v50 }
 0x1c9   :  { %974 = vmatprep.mubr.f32.mxu0 %v3696_v0  ;;  %1082 = vmatprep.subr.mxu0 %v749_v3 }
 0x1ca   :  { %2909 = vmatmul.mubr.msk.f32.vlgmr.msra.gmra.mxu1 %vm94_vm2, %v3760_v8  ;;  %2908 = vmatmul.mubr.msk.f32.vlgmr.msra.gmra.mxu0 %vm94_vm2, %v3760_v8  ;;  %v3912_v8 = vld [vmem:[#allocation7 + $0x2a0] sm:$0xff] }
 0x1cb   :  { %1154 = vmatpush1.msra.mxu1 %v750_v4  ;;  %1187 = vmatprep.mubr.f32.mxu1 %v3696_v0 }
 0x1cc   :  { %1295 = vmatprep.subr.mxu1 %v755_v5  ;;  %1083 = vmatpush1.msra.mxu0 %v748_v6 }
 0x1cd   :  { %1116 = vmatprep.mubr.f32.mxu0 %v3696_v0  ;;  %1224 = vmatprep.subr.mxu0 %v753_v9 }
 0x1ce   :  { %2911 = vmatmul.mubr.msk.f32.vlgmr.msra.gmra.mxu1 %vm94_vm2, %v3758_v7  ;;  %2910 = vmatmul.mubr.msk.f32.vlgmr.msra.gmra.mxu0 %vm94_vm2, %v3758_v7 }
 0x1cf   :  { %1296 = vmatpush1.msra.mxu1 %v754_v10  ;;  %1329 = vmatprep.mubr.f32.mxu1 %v3696_v0 }
 0x1d0   :  { %3346 = vmatprep.subr.mxu1 %v3696_v0  ;;  %1225 = vmatpush1.msra.mxu0 %v752_v11 }
 0x1d1   :  { %1258 = vmatprep.mubr.f32.mxu0 %v3696_v0  ;;  %3390 = vmatprep.subr.mxu0 %v3696_v0 }
 0x1d2   :  { %2913 = vmatmul.mubr.msk.f32.vlgmr.msra.gmra.mxu1 %vm94_vm2, %v3758_v7  ;;  %2912 = vmatmul.mubr.msk.f32.vlgmr.msra.gmra.mxu0 %vm94_vm2, %v3758_v7 }
 0x1d3   :  { %3347 = vmatpush3.msra.mxu1 %v3912_v8  ;;  %3354 = vmatprep.mubr.msk.f32.mxu1 %vm3697_vm0, %v3696_v0 }
 0x1d4   :  { %3348 = vmatprep.subr.mxu1 %v3696_v0  ;;  %3391 = vmatpush3.msra.mxu0 %v3912_v8 }
 0x1d5   :  { %3349 = vmatpush3.msra.mxu1 %v3918_v12  ;;  %3392 = vmatprep.subr.mxu0 %v3696_v0 }
 0x1d6   :  { %3350 = vmatprep.subr.mxu1 %v3696_v0  ;;  %3393 = vmatpush3.msra.mxu0 %v3918_v12 }
 0x1d7   :  { %3351 = vmatpush3.msra.mxu1 %v3926_v13  ;;  %3394 = vmatprep.subr.mxu0 %v3696_v0 }
 0x1d8   :  { %3352 = vmatprep.subr.mxu1 %v3696_v0  ;;  %3395 = vmatpush3.msra.mxu0 %v3926_v13 }
 0x1d9   :  { %3353 = vmatpush3.msra.mxu1 %v3932_v14  ;;  %3396 = vmatprep.subr.mxu0 %v3696_v0 }
 0x1da   :  { %3355 = vmatmul.mubr.f32.vlgmr.msra.gmra.mxu1 %v3696_v0  ;;  %3357 = vmatprep.subr.mxu1 %v3696_v0 }
 0x1db   :  { %3358 = vmatpush3.msra.mxu1 %v3912_v8  ;;  %3365 = vmatprep.mubr.msk.f32.mxu1 %vm3697_vm0, %v3696_v0 }
 0x1dc   :  { %3359 = vmatprep.subr.mxu1 %v3696_v0  ;;  %3397 = vmatpush3.msra.mxu0 %v3932_v14 }
 0x1dd   :  { %v495_v7 = vpop.f32.mrf.mxu0  ;;  %v565_v15 = vpop.f32.mrf.mxu1  ;;  %3360 = vmatpush3.msra.mxu1 %v3918_v12  ;;  %3398 = vmatprep.mubr.msk.f32.mxu0 %vm3697_vm0, %v3696_v0 }
 0x1de   :  { %v566_v16 = vadd.f32 %v565_v15, %v495_v7  ;;  %3361 = vmatprep.subr.mxu1 %v3696_v0  ;;  %3412 = vmatprep.subr.mxu0 %v3696_v0  ;;  %v3983_v15 = vrot.slane %v3805_v27, %v1347_v22 }
 0x1df   :  { %v3240_v17 = vpop.f32.mrf.mxu0  ;;  %v3275_v18 = vpop.f32.mrf.mxu1  ;;  %3362 = vmatpush3.msra.mxu1 %v3926_v13 }
 0x1e0   :  { %3363 = vmatprep.subr.mxu1 %v3696_v0 }
 0x1e1   :  { %3364 = vmatpush3.msra.mxu1 %v3932_v14 }
 0x1e2   :  { %3368 = vmatprep.subr.mxu1 %v3696_v0 }
 0x282   :  { %v651_v28 = vpop.f32.mrf.mxu0  ;;  %v738_v29 = vpop.f32.mrf.mxu1 }
 0x283   :  { %v655_v30 = vadd.f32 %v651_v28, %v566_v16 }
 0x284   :  { %v3345_v32 = vpop.f32.mrf.mxu1  ;;  %v3310_v33 = vpop.f32.mrf.mxu0 }
 0x285   :  { %v742_v34 = vadd.f32 %v738_v29, %v655_v30 }
 0x286   :  { %v905_v35 = vpop.f32.mrf.mxu1  ;;  %v834_v36 = vpop.f32.mrf.mxu0 }
 0x287   :  { %v3960_v37 = vadd.f32 %v746_v31, %v742_v34 }
 0x288   :  { %v907_v38 = vpop.f32.mrf.mxu1  ;;  %v836_v39 = vpop.f32.mrf.mxu0 }
 0x28a   :  { %v1047_v40 = vpop.f32.mrf.mxu1  ;;  %v976_v41 = vpop.f32.mrf.mxu0 }
 0x28c   :  { %v1049_v42 = vpop.f32.mrf.mxu1  ;;  %v978_v44 = vpop.f32.mrf.mxu0 }
 0x28e   :  { %v1189_v46 = vpop.f32.mrf.mxu1  ;;  %v1118_v49 = vpop.f32.mrf.mxu0 }
 0x28f   :  { %v1190_v51 = vadd.f32 %v1189_v46, %v905_v35 }
 0x290   :  { %v1191_v54 = vpop.f32.mrf.mxu1  ;;  %v1120_v56 = vpop.f32.mrf.mxu0 }
 0x291   :  { %v3968_v57 = vadd.f32 %v1348_v23, %v1190_v51  ;;  %v1192_v58 = vadd.f32 %v1191_v54, %v907_v38  ;;  %v1121_v59 = vadd.f32 %v1120_v56, %v836_v39  ;;  %v1119_v23 = vadd.f32 %v1118_v49, %v834_v36 }
 0x292   :  { %v1331_v61 = vpop.f32.mrf.mxu1  ;;  %v1260_v63 = vpop.f32.mrf.mxu0 }
 0x293   :  { %v3974_v2 = vadd.f32 %v1352_v52, %v1192_v58  ;;  %v1332_v3 = vadd.f32 %v1331_v61, %v1047_v40  ;;  %v3976_v47 = vadd.f32 %v1344_v53, %v1121_v59  ;;  %v1261_v4 = vadd.f32 %v1260_v63, %v976_v41 }
 0x294   :  { %v1333_v5 = vpop.f32.mrf.mxu1  ;;  %v1262_v6 = vpop.f32.mrf.mxu0  ;;  %v1377_v28 = vadd.f32 %v1340_v24, %v1119_v23 }
 0x295   :  { %v3978_v9 = vadd.f32 %v1364_v55, %v1332_v3  ;;  %v1334_v10 = vadd.f32 %v1333_v5, %v1049_v42  ;;  %v3980_v11 = vadd.f32 %v1356_v60, %v1261_v4  ;;  %v1263_v7 = vadd.f32 %v1262_v6, %v978_v44 }
 0x297   :  { %v3985_v16 = vadd.f32 %v1368_v62, %v1334_v10  ;;  %v3987_v17 = vadd.f32 %v1360_v1, %v1263_v7 }
 0x29a   :  { %v1467_v18 = vpop.f32.mrf.mxu1 }
 0x29b   :  { %v1468_v19 = vadd.f32 %v1467_v18, %v3983_v15 }
 0x29c   :  { %v3356_v20 = vpop.f32.mrf.mxu1 }
 0x29d   :  { %1479 = vrot.lane.b32.xlu0 %v1468_v19, %s3695_s18  ;;  %v1471_v29 = vadd.f32 %v1468_v19, %v1377_v28 }
 0x29f   :  { %v2914_v30 = vmul.f32 -1.442695, %v1471_v29 }
 0x2a1   :  { %3526 = vpow2.f32 %v2914_v30 }
 0x2ae   :  { %v3527_v27 = vpop.eup %3526 }
 0x2af   :  { %v1475_v22 = vadd.f32 1.0, %v3527_v27 }
 0x2b1   :  { %3528 = vrcp.f32 %v1475_v22 }
 0x2be   :  { %v3529_v31 = vpop.eup %3528 }
 0x2bf   :  { %v1489_v26 = vsub.f32 1.0, %v3529_v31  ;;  %v1495_v36 = vmul.f32 0.0, %v3529_v31 }
 0x30f   :  { %v1480_v32 = vpop.permute.xlu0 %1479 }
 0x310   :  { %v1482_v33 = vmul.f32 %v3529_v31, %v1480_v32 }
 0x312   :  { %1484 = vrot.lane.b32.xlu0 %v1482_v33, %s3695_s18 }
 0x384   :  { %v1485_v34 = vpop.permute.xlu0 %1484 }
 0x385   :  { %v1487_v35 = vadd.f32 %v1485_v34, %v1377_v28 }
 0x387   :  { %3530 = vtanh.f32 %v1487_v35 }
 0x394   :  { %v3531_v38 = vpop.eup %3530 }
 0x395   :  { %1491 = vrot.lane.b32.xlu1 %v3531_v38, %s3698_s4 }
 0x407   :  { %v1492_v21 = vpop.permute.xlu1 %1491 }
 0x408   :  { %v1494_v39 = vmul.f32 %v1492_v21, %v1489_v26 }
 0x40a   :  { %v1496_v40 = vadd.f32 %v1495_v36, %v1494_v39 }
 0x40c   :  { %1498 = vrot.lane.b32.xlu1 %v1496_v40, %s3698_s4 }
 0x47e   :  { %v1499_v41 = vpop.permute.xlu1 %1498 }
 0x47f   :  { %3366 = vmatmul.mubr.msk.f32.vlgmr.msra.gmra.mxu1 %vm1397_vm7, %v1499_v41 }
 0x480   :  { %3369 = vmatpush3.msra.mxu1 %v3912_v8  ;;  %3376 = vmatprep.mubr.msk.f32.mxu1 %vm3697_vm0, %v3696_v0 }
 0x481   :  { %3370 = vmatprep.subr.mxu1 %v3696_v0 }
 0x482   :  { %3371 = vmatpush3.msra.mxu1 %v3918_v12 }
 0x483   :  { %3372 = vmatprep.subr.mxu1 %v3696_v0 }
 0x484   :  { %3373 = vmatpush3.msra.mxu1 %v3926_v13 }
 0x485   :  { %3374 = vmatprep.subr.mxu1 %v3696_v0 }
 0x486   :  { %3375 = vmatpush3.msra.mxu1 %v3932_v14 }
 0x487   :  { %3379 = vmatprep.subr.mxu1 %v3696_v0 }
 0x53f   :  { %v1568_v42 = vpop.f32.mrf.mxu1 }
 0x540   :  { %v1569_v43 = vadd.f32 %v1568_v42, %v3983_v15 }
 0x541   :  { %v3367_v44 = vpop.f32.mrf.mxu1 }
 0x542   :  { %1580 = vrot.lane.b32.xlu0 %v1569_v43, %s3695_s18  ;;  %v1572_v46 = vadd.f32 %v1569_v43, %v3976_v47 }
 0x544   :  { %v2916_v48 = vmul.f32 -1.442695, %v1572_v46 }
 0x546   :  { %3532 = vpow2.f32 %v2916_v48 }
 0x553   :  { %v3533_v49 = vpop.eup %3532 }
 0x554   :  { %v1576_v51 = vadd.f32 1.0, %v3533_v49 }
 0x556   :  { %3534 = vrcp.f32 %v1576_v51 }
 0x563   :  { %v3535_v52 = vpop.eup %3534 }
 0x564   :  { %v1590_v59 = vsub.f32 1.0, %v3535_v52  ;;  %v1596_v61 = vmul.f32 %v3535_v52, %v1496_v40 }
 0x5b4   :  { %v1581_v53 = vpop.permute.xlu0 %1580 }
 0x5b5   :  { %v1583_v54 = vmul.f32 %v3535_v52, %v1581_v53 }
 0x5b7   :  { %1585 = vrot.lane.b32.xlu1 %v1583_v54, %s3695_s18 }
 0x629   :  { %v1586_v55 = vpop.permute.xlu1 %1585 }
 0x62a   :  { %v1588_v56 = vadd.f32 %v1586_v55, %v3976_v47 }
 0x62c   :  { %3536 = vtanh.f32 %v1588_v56 }
 0x639   :  { %v3537_v58 = vpop.eup %3536 }
 0x63a   :  { %1592 = vrot.lane.b32.xlu0 %v3537_v58, %s3698_s4 }
 0x6ac   :  { %v1593_v60 = vpop.permute.xlu0 %1592 }
 0x6ad   :  { %v1595_v62 = vmul.f32 %v1593_v60, %v1590_v59 }
 0x6af   :  { %v1597_v63 = vadd.f32 %v1596_v61, %v1595_v62 }
 0x6b1   :  { %1599 = vrot.lane.b32.xlu1 %v1597_v63, %s3698_s4 }
 0x723   :  { %v1600_v1 = vpop.permute.xlu1 %1599 }
 0x724   :  { %3377 = vmatmul.mubr.msk.f32.vlgmr.msra.gmra.mxu1 %vm1397_vm7, %v1600_v1 }
 0x725   :  { %3380 = vmatpush3.msra.mxu1 %v3912_v8  ;;  %3387 = vmatprep.mubr.msk.f32.mxu1 %vm3697_vm0, %v3696_v0 }
 0x726   :  { %3381 = vmatprep.subr.mxu1 %v3696_v0 }
 0x727   :  { %3382 = vmatpush3.msra.mxu1 %v3918_v12 }
 0x728   :  { %3383 = vmatprep.subr.mxu1 %v3696_v0 }
 0x729   :  { %3384 = vmatpush3.msra.mxu1 %v3926_v13 }
 0x72a   :  { %3385 = vmatprep.subr.mxu1 %v3696_v0 }
 0x72b   :  { %3386 = vmatpush3.msra.mxu1 %v3932_v14 }
 0x72c   :  { %3401 = vmatprep.subr.mxu1 %v3696_v0 }
 0x7e4   :  { %v1669_v3 = vpop.f32.mrf.mxu1 }
 0x7e5   :  { %v1670_v47 = vadd.f32 %v1669_v3, %v3983_v15 }
 0x7e6   :  { %v3378_v4 = vpop.f32.mrf.mxu1 }
 0x7e7   :  { %1681 = vrot.lane.b32.xlu0 %v1670_v47, %s3695_s18  ;;  %v1673_v5 = vadd.f32 %v1670_v47, %v3968_v57 }
 0x7e9   :  { %v2918_v6 = vmul.f32 -1.442695, %v1673_v5 }
 0x7eb   :  { %3538 = vpow2.f32 %v2918_v6 }
 0x7f8   :  { %v3539_v10 = vpop.eup %3538 }
 0x7f9   :  { %v1677_v7 = vadd.f32 1.0, %v3539_v10 }
 0x7fb   :  { %3540 = vrcp.f32 %v1677_v7 }
 0x808   :  { %v3541_v18 = vpop.eup %3540 }
 0x809   :  { %v1691_v29 = vsub.f32 1.0, %v3541_v18  ;;  %v1697_v27 = vmul.f32 %v3541_v18, %v1597_v63 }
 0x859   :  { %v1682_v19 = vpop.permute.xlu0 %1681 }
 0x85a   :  { %v1684_v20 = vmul.f32 %v3541_v18, %v1682_v19 }
 0x85c   :  { %1686 = vrot.lane.b32.xlu1 %v1684_v20, %s3695_s18 }
 0x8ce   :  { %v1687_v23 = vpop.permute.xlu1 %1686 }
 0x8cf   :  { %v1689_v24 = vadd.f32 %v1687_v23, %v3968_v57 }
 0x8d1   :  { %3542 = vtanh.f32 %v1689_v24 }
 0x8de   :  { %v3543_v28 = vpop.eup %3542 }
 0x8df   :  { %1693 = vrot.lane.b32.xlu0 %v3543_v28, %s3698_s4 }
 0x951   :  { %v1694_v30 = vpop.permute.xlu0 %1693 }
 0x952   :  { %v1696_v22 = vmul.f32 %v1694_v30, %v1691_v29 }
 0x954   :  { %v1698_v31 = vadd.f32 %v1697_v27, %v1696_v22  ;;  %v2205_v27 = vld [vmem:[#allocation9 + $0xc8] sm:$0xf] }
 0x956   :  { %1700 = vrot.lane.b32.xlu1 %v1698_v31, %s3698_s4 }
 0x9c8   :  { %v1701_v32 = vpop.permute.xlu1 %1700 }
 0x9c9   :  { %3388 = vmatmul.mubr.msk.f32.vlgmr.msra.gmra.mxu1 %vm1397_vm7, %v1701_v32 }
 0x9ca   :  { %3402 = vmatpush3.msra.mxu1 %v3912_v8  ;;  %3409 = vmatprep.mubr.msk.f32.mxu1 %vm3697_vm0, %v3696_v0 }
 0x9cb   :  { %3403 = vmatprep.subr.mxu1 %v3696_v0 }
 0x9cc   :  { %3404 = vmatpush3.msra.mxu1 %v3918_v12 }
 0x9cd   :  { %3405 = vmatprep.subr.mxu1 %v3696_v0 }
 0x9ce   :  { %3406 = vmatpush3.msra.mxu1 %v3926_v13 }
 0x9cf   :  { %3407 = vmatprep.subr.mxu1 %v3696_v0 }
 0x9d0   :  { %3408 = vmatpush3.msra.mxu1 %v3932_v14 }
 0x9d1   :  { %3423 = vmatprep.subr.mxu1 %v3696_v0 }
 0xa89   :  { %v1770_v57 = vpop.f32.mrf.mxu1 }
 0xa8a   :  { %v1771_v33 = vadd.f32 %v1770_v57, %v3983_v15 }
 0xa8b   :  { %v3389_v34 = vpop.f32.mrf.mxu1 }
 0xa8c   :  { %1782 = vrot.lane.b32.xlu0 %v1771_v33, %s3695_s18  ;;  %v1774_v35 = vadd.f32 %v1771_v33, %v3974_v2  ;;  %v2204_v34 = vld [vmem:[#allocation9 + $0xc0] sm:$0xf] }
 0xa8e   :  { %v2920_v38 = vmul.f32 -1.442695, %v1774_v35 }
 0xa90   :  { %3544 = vpow2.f32 %v2920_v38 }
 0xa9d   :  { %v3545_v26 = vpop.eup %3544 }
 0xa9e   :  { %v1778_v21 = vadd.f32 1.0, %v3545_v26 }
 0xaa0   :  { %3546 = vrcp.f32 %v1778_v21 }
 0xaad   :  { %v3547_v36 = vpop.eup %3546 }
 0xaae   :  { %v1792_v44 = vsub.f32 1.0, %v3547_v36  ;;  %v1798_v48 = vmul.f32 %v3547_v36, %v1698_v31 }
 0xafe   :  { %v1783_v39 = vpop.permute.xlu0 %1782 }
 0xaff   :  { %v1785_v40 = vmul.f32 %v3547_v36, %v1783_v39 }
 0xb01   :  { %1787 = vrot.lane.b32.xlu1 %v1785_v40, %s3695_s18 }
 0xb73   :  { %v1788_v41 = vpop.permute.xlu1 %1787 }
 0xb74   :  { %v1790_v42 = vadd.f32 %v1788_v41, %v3974_v2 }
 0xb76   :  { %3548 = vtanh.f32 %v1790_v42 }
 0xb83   :  { %v3549_v43 = vpop.eup %3548 }
 0xb84   :  { %1794 = vrot.lane.b32.xlu0 %v3549_v43, %s3698_s4 }
 0xbf6   :  { %v1795_v46 = vpop.permute.xlu0 %1794 }
 0xbf7   :  { %v1797_v49 = vmul.f32 %v1795_v46, %v1792_v44 }
 0xbf9   :  { %v1799_v51 = vadd.f32 %v1798_v48, %v1797_v49 }
 0xbfb   :  { %1801 = vrot.lane.b32.xlu1 %v1799_v51, %s3698_s4 }
 0xc6d   :  { %v1802_v52 = vpop.permute.xlu1 %1801 }
 0xc6e   :  { %3399 = vmatmul.mubr.msk.f32.vlgmr.msra.gmra.mxu0 %vm1397_vm7, %v1802_v52 }
 0xc6f   :  { %3413 = vmatpush3.msra.mxu0 %v3912_v8  ;;  %3420 = vmatprep.mubr.msk.f32.mxu0 %vm3697_vm0, %v3696_v0 }
 0xc70   :  { %3414 = vmatprep.subr.mxu0 %v3696_v0 }
 0xc71   :  { %3415 = vmatpush3.msra.mxu0 %v3918_v12 }
 0xc72   :  { %3416 = vmatprep.subr.mxu0 %v3696_v0 }
 0xc73   :  { %3417 = vmatpush3.msra.mxu0 %v3926_v13 }
 0xc74   :  { %3418 = vmatprep.subr.mxu0 %v3696_v0 }
 0xc75   :  { %3419 = vmatpush3.msra.mxu0 %v3932_v14 }
 0xc76   :  { %2929 = vmatprep.subr.msk.mxu0 %vm2213_vm8, %v2205_v27 }
 0xd2e   :  { %v1871_v2 = vpop.f32.mrf.mxu0 }
 0xd2f   :  { %v1872_v53 = vadd.f32 %v1871_v2, %v3983_v15 }
 0xd30   :  { %v3400_v54 = vpop.f32.mrf.mxu0 }
 0xd31   :  { %1883 = vrot.lane.b32.xlu0 %v1872_v53, %s3695_s18  ;;  %v1875_v55 = vadd.f32 %v1872_v53, %v3980_v11 }
 0xd33   :  { %v2922_v56 = vmul.f32 -1.442695, %v1875_v55 }
 0xd35   :  { %3550 = vpow2.f32 %v2922_v56  ;;  %v2206_v56 = vld [vmem:[#allocation9 + $0xd0] sm:$0xf] }
 0xd42   :  { %v3551_v58 = vpop.eup %3550 }
 0xd43   :  { %v1879_v59 = vadd.f32 1.0, %v3551_v58 }
 0xd45   :  { %3552 = vrcp.f32 %v1879_v59 }
 0xd52   :  { %v3553_v60 = vpop.eup %3552 }
 0xd53   :  { %v1893_v47 = vsub.f32 1.0, %v3553_v60  ;;  %v1899_v5 = vmul.f32 %v3553_v60, %v1799_v51  ;;  %v2207_v51 = vld [vmem:[#allocation9 + $0xd8] sm:$0xf] }
 0xda3   :  { %v1884_v61 = vpop.permute.xlu0 %1883 }
 0xda4   :  { %v1886_v62 = vmul.f32 %v3553_v60, %v1884_v61 }
 0xda6   :  { %1888 = vrot.lane.b32.xlu1 %v1886_v62, %s3695_s18 }
 0xe18   :  { %v1889_v63 = vpop.permute.xlu1 %1888 }
 0xe19   :  { %v1891_v1 = vadd.f32 %v1889_v63, %v3980_v11 }
 0xe1b   :  { %3554 = vtanh.f32 %v1891_v1 }
 0xe28   :  { %v3555_v3 = vpop.eup %3554 }
 0xe29   :  { %1895 = vrot.lane.b32.xlu0 %v3555_v3, %s3698_s4 }
 0xe9b   :  { %v1896_v4 = vpop.permute.xlu0 %1895 }
 0xe9c   :  { %v1898_v6 = vmul.f32 %v1896_v4, %v1893_v47 }
 0xe9e   :  { %v1900_v10 = vadd.f32 %v1899_v5, %v1898_v6 }
 0xea0   :  { %1902 = vrot.lane.b32.xlu1 %v1900_v10, %s3698_s4 }
 0xf12   :  { %v1903_v7 = vpop.permute.xlu1 %1902 }
 0xf13   :  { %3410 = vmatmul.mubr.msk.f32.vlgmr.msra.gmra.mxu1 %vm1397_vm7, %v1903_v7  ;;  %v4122_v7 = vld [vmem:[#allocation7 + $0x2b0] sm:$0xff] }
 0xf14   :  { %3424 = vmatpush3.msra.mxu1 %v3912_v8  ;;  %3431 = vmatprep.mubr.msk.f32.mxu1 %vm3697_vm0, %v3696_v0 }
 0xf15   :  { %3425 = vmatprep.subr.mxu1 %v3696_v0 }
 0xf16   :  { %3426 = vmatpush3.msra.mxu1 %v3918_v12 }
 0xf17   :  { %3427 = vmatprep.subr.mxu1 %v3696_v0 }
 0xf18   :  { %3428 = vmatpush3.msra.mxu1 %v3926_v13 }
 0xf19   :  { %3429 = vmatprep.subr.mxu1 %v3696_v0 }
 0xf1a   :  { %3430 = vmatpush3.msra.mxu1 %v3932_v14 }
 0xf1b   :  { %2932 = vmatprep.subr.msk.mxu1 %vm2213_vm8, %v2207_v51 }
 0xfd3   :  { %v1972_v11 = vpop.f32.mrf.mxu1 }
 0xfd4   :  { %v1973_v18 = vadd.f32 %v1972_v11, %v3983_v15 }
 0xfd5   :  { %v3411_v19 = vpop.f32.mrf.mxu1 }
 0xfd6   :  { %1984 = vrot.lane.b32.xlu0 %v1973_v18, %s3695_s18  ;;  %v1976_v8 = vadd.f32 %v1973_v18, %v3987_v17 }
 0xfd8   :  { %v2924_v20 = vmul.f32 -1.442695, %v1976_v8 }
 0xfda   :  { %3556 = vpow2.f32 %v2924_v20 }
 0xfe7   :  { %v3557_v23 = vpop.eup %3556 }
 0xfe8   :  { %v1980_v12 = vadd.f32 1.0, %v3557_v23 }
 0xfea   :  { %3558 = vrcp.f32 %v1980_v12 }
 0xff7   :  { %v3559_v24 = vpop.eup %3558 }
 0xff8   :  { %v1994_v22 = vsub.f32 1.0, %v3559_v24  ;;  %v2000_v32 = vmul.f32 %v3559_v24, %v1900_v10  ;;  %v4117_v10 = vld [vmem:[#allocation7 + $0x2b8] sm:$0xff] }
0x1048   :  { %v1985_v28 = vpop.permute.xlu0 %1984 }
0x1049   :  { %v1987_v13 = vmul.f32 %v3559_v24, %v1985_v28  ;;  %v4152_v28 = vld [vmem:[#allocation7 + $0x348] sm:$0xff] }
0x104b   :  { %1989 = vrot.lane.b32.xlu1 %v1987_v13, %s3695_s18  ;;  %v4157_v13 = vrot.slane %v4152_v28, %v1355_v45 }
0x10bd   :  { %v1990_v29 = vpop.permute.xlu1 %1989 }
0x10be   :  { %v1992_v14 = vadd.f32 %v1990_v29, %v3987_v17  ;;  %v2208_v17 = vld [vmem:[%s4236_s2] sm:$0x3]  ;;  %s3699_s2 = smov [#allocation10]  }
0x10bf   :  { %s2891_s23 = sshll.u32 %s3699_s2, 4  ;;  %s2892_s23 = int_to_ptr.vmem [resolvable:$true] %s2891_s23 }
0x10c0   :  { %3560 = vtanh.f32 %v1992_v14  ;;  %s3661_s24 = scalar_lea.vmem %s2892_s23, 32  ;;  %p3666_p7 = scmp.lt.s32.totalorder %s2892_s23, %s2892_s23 }
0x10c1   :  { %p3662_p6 = scmp.ne.s32.totalorder %s2892_s23, %s3661_s24  ;;  %p3667_p8 = scmp.lt.s32.totalorder %s3661_s24, %s3661_s24 }
0x10c3   :  { %p3668_p9 = por %p3667_p8, %p3666_p7 }
0x10c5   :  { %p3669_p10 = pnand %p3668_p9, %p3662_p6 }
0x10cd   :  { %v3561_v30 = vpop.eup %3560 }
0x10ce   :  { %1996 = vrot.lane.b32.xlu0 %v3561_v30, %s3698_s4 }
0x1140   :  { %v1997_v31 = vpop.permute.xlu0 %1996 }
0x1141   :  { %v1999_v57 = vmul.f32 %v1997_v31, %v1994_v22 }
0x1143   :  { %v2001_v33 = vadd.f32 %v2000_v32, %v1999_v57 }
0x1145   :  { %2003 = vrot.lane.b32.xlu1 %v2001_v33, %s3698_s4 }
0x11b7   :  { %v2004_v35 = vpop.permute.xlu1 %2003 }
0x11b8   :  { %3421 = vmatmul.mubr.msk.f32.vlgmr.msra.gmra.mxu0 %vm1397_vm7, %v2004_v35 }
0x11b9   :  { %2930 = vmatpush1.msk.msra.mxu0 %vm2213_vm8, %v2204_v34  ;;  %2290 = vmatprep.mubr.f32.mxu0 %v3696_v0 }
0x11ba   :  { %3434 = vmatprep.subr.mxu0 %v3696_v0 }
0x11bc   :  { %2931 = vmatmul.mubr.msk.f32.vlgmr.msra.gmra.mxu0 %vm2209_vm9, %v2208_v17 }
0x11bd   :  { %3442 = vmatprep.mubr.msk.f32.mxu0 %vm3697_vm0, %v3696_v0 }
0x1278   :  { %v2073_v38 = vpop.f32.mrf.mxu0 }
0x1279   :  { %v2074_v26 = vadd.f32 %v2073_v38, %v3983_v15 }
0x127a   :  { %v3422_v21 = vpop.f32.mrf.mxu0 }
0x127b   :  { %2085 = vrot.lane.b32.xlu0 %v2074_v26, %s3695_s18  ;;  %v2077_v36 = vadd.f32 %v2074_v26, %v3978_v9 }
0x127c   :  { %v2292_v24 = vpop.f32.mrf.mxu0 }
0x127d   :  { %v2926_v39 = vmul.f32 -1.442695, %v2077_v36  ;;  %v2368_v22 = vadd.f32 %v2292_v24, %v3960_v37 }
0x127e   :  { %v2294_v29 = vpop.f32.mrf.mxu0 }
0x127f   :  { %3562 = vpow2.f32 %v2926_v39  ;;  %v2474_v51 = vadd.f32 %v2294_v29, %v3960_v37 }
0x128c   :  { %v3563_v40 = vpop.eup %3562 }
0x128d   :  { %v2081_v41 = vadd.f32 1.0, %v3563_v40 }
0x128f   :  { %3564 = vrcp.f32 %v2081_v41 }
0x129c   :  { %v3565_v42 = vpop.eup %3564 }
0x129d   :  { %v2095_v52 = vsub.f32 1.0, %v3565_v42  ;;  %v2101_v53 = vmul.f32 %v3565_v42, %v2001_v33 }
0x12ed   :  { %v2086_v43 = vpop.permute.xlu0 %2085 }
0x12ee   :  { %v2088_v44 = vmul.f32 %v3565_v42, %v2086_v43 }
0x12f0   :  { %2090 = vrot.lane.b32.xlu1 %v2088_v44, %s3695_s18 }
0x1362   :  { %v2091_v46 = vpop.permute.xlu1 %2090 }
0x1363   :  { %v2093_v48 = vadd.f32 %v2091_v46, %v3978_v9 }
0x1365   :  { %3566 = vtanh.f32 %v2093_v48 }
0x1372   :  { %v3567_v49 = vpop.eup %3566 }
0x1373   :  { %2097 = vrot.lane.b32.xlu0 %v3567_v49, %s3698_s4 }
0x13e5   :  { %v2098_v2 = vpop.permute.xlu0 %2097 }
0x13e6   :  { %v2100_v54 = vmul.f32 %v2098_v2, %v2095_v52 }
0x13e8   :  { %v2102_v55 = vadd.f32 %v2101_v53, %v2100_v54 }
0x13ea   :  { %2104 = vrot.lane.b32.xlu1 %v2102_v55, %s3698_s4 }
0x145c   :  { %v2105_v58 = vpop.permute.xlu1 %2104 }
0x145d   :  { %3432 = vmatmul.mubr.msk.f32.vlgmr.msra.gmra.mxu1 %vm1397_vm7, %v2105_v58 }
0x145e   :  { %2933 = vmatpush1.msk.msra.mxu1 %vm2213_vm8, %v2206_v56  ;;  %2361 = vmatprep.mubr.f32.mxu1 %v3696_v0 }
0x145f   :  { %3445 = vmatprep.subr.mxu1 %v3696_v0 }
0x1461   :  { %2934 = vmatmul.mubr.msk.f32.vlgmr.msra.gmra.mxu1 %vm2209_vm9, %v2208_v17 }
0x1462   :  { %3453 = vmatprep.mubr.msk.f32.mxu1 %vm3697_vm0, %v3696_v0 }
0x151d   :  { %v2174_v9 = vpop.f32.mrf.mxu1 }
0x151e   :  { %v2175_v59 = vadd.f32 %v2174_v9, %v3983_v15  ;;  %v4115_v15 = vld [vmem:[#allocation7 + $0x2c0] sm:$0xff] }
0x151f   :  { %v3433_v60 = vpop.f32.mrf.mxu1  ;;  %3435 = vmatpush3.msra.mxu0 %v4115_v15  ;;  %3446 = vmatpush3.msra.mxu1 %v4115_v15 }
0x1520   :  { %2186 = vrot.lane.b32.xlu0 %v2175_v59, %s3695_s18  ;;  %v2178_v61 = vadd.f32 %v2175_v59, %v3985_v16  ;;  %3436 = vmatprep.subr.mxu0 %v3696_v0 }
0x1521   :  { %3447 = vmatprep.subr.mxu1 %v3696_v0  ;;  %3437 = vmatpush3.msra.mxu0 %v4117_v10  ;;  %v2363_v43 = vpop.f32.mrf.mxu1 }
0x1522   :  { %v2928_v62 = vmul.f32 -1.442695, %v2178_v61  ;;  %3448 = vmatpush3.msra.mxu1 %v4117_v10  ;;  %3438 = vmatprep.subr.mxu0 %v3696_v0 }
0x1523   :  { %3449 = vmatprep.subr.mxu1 %v3696_v0  ;;  %3439 = vmatpush3.msra.mxu0 %v4122_v7  ;;  %v2365_v44 = vpop.f32.mrf.mxu1 }
0x1524   :  { %3568 = vpow2.f32 %v2928_v62  ;;  %3450 = vmatpush3.msra.mxu1 %v4122_v7  ;;  %3440 = vmatprep.subr.mxu0 %v3696_v0 }
0x1525   :  { %3451 = vmatprep.subr.mxu1 %v3696_v0 }
0x1531   :  { %v3569_v63 = vpop.eup %3568 }
0x1532   :  { %v2182_v1 = vadd.f32 1.0, %v3569_v63 }
0x1534   :  { %3570 = vrcp.f32 %v2182_v1 }
0x1541   :  { %v3571_v3 = vpop.eup %3570 }
0x1542   :  { %v2196_v18 = vsub.f32 1.0, %v3571_v3  ;;  %v2202_v8 = vmul.f32 %v3571_v3, %v2102_v55 }
0x1592   :  { %v2187_v47 = vpop.permute.xlu0 %2186 }
0x1593   :  { %v2189_v4 = vmul.f32 %v3571_v3, %v2187_v47 }
0x1595   :  { %2191 = vrot.lane.b32.xlu1 %v2189_v4, %s3695_s18 }
0x1607   :  { %v2192_v5 = vpop.permute.xlu1 %2191 }
0x1608   :  { %v2194_v6 = vadd.f32 %v2192_v5, %v3985_v16  ;;  %v4128_v16 = vld [vmem:[#allocation7 + $0x2a8] sm:$0xff] }
0x1609   :  { %3441 = vmatpush3.msra.mxu0 %v4128_v16  ;;  %3452 = vmatpush3.msra.mxu1 %v4128_v16 }
0x160a   :  { %3572 = vtanh.f32 %v2194_v6  ;;  %3456 = vmatprep.subr.mxu0 %v3696_v0  ;;  %3467 = vmatprep.subr.mxu1 %v3696_v0 }
0x1617   :  { %v3573_v11 = vpop.eup %3572 }
0x1618   :  { %2198 = vrot.lane.b32.xlu0 %v3573_v11, %s3698_s4 }
0x168a   :  { %v2199_v19 = vpop.permute.xlu0 %2198 }
0x168b   :  { %v2201_v20 = vmul.f32 %v2199_v19, %v2196_v18 }
0x168d   :  { %v2203_v23 = vadd.f32 %v2202_v8, %v2201_v20 }
0x168f   :  { %2374 = vrot.lane.b32.xlu1 %v2203_v23, %s3698_s4 }
0x1701   :  { %v2375_v12 = vpop.permute.xlu1 %2374 }
0x1702   :  { %3443 = vmatmul.mubr.msk.f32.vlgmr.msra.gmra.mxu0 %vm1397_vm7, %v2375_v12 }
0x1703   :  { %3457 = vmatpush3.msra.mxu0 %v4115_v15  ;;  %3464 = vmatprep.mubr.msk.f32.mxu0 %vm3697_vm0, %v3696_v0 }
0x1704   :  { %3458 = vmatprep.subr.mxu0 %v3696_v0 }
0x1705   :  { %3459 = vmatpush3.msra.mxu0 %v4117_v10 }
0x1706   :  { %3460 = vmatprep.subr.mxu0 %v3696_v0 }
0x1707   :  { %3461 = vmatpush3.msra.mxu0 %v4122_v7 }
0x1708   :  { %3462 = vmatprep.subr.mxu0 %v3696_v0 }
0x1709   :  { %3463 = vmatpush3.msra.mxu0 %v4128_v16 }
0x170a   :  { %3478 = vmatprep.subr.mxu0 %v3696_v0 }
0x17c2   :  { %v2444_v14 = vpop.f32.mrf.mxu0 }
0x17c3   :  { %v2445_v30 = vadd.f32 %v2444_v14, %v4157_v13 }
0x17c4   :  { %v3444_v27 = vpop.f32.mrf.mxu0 }
0x17c5   :  { %2456 = vrot.lane.b32.xlu0 %v2445_v30, %s3695_s18  ;;  %v2448_v31 = vadd.f32 %v2445_v30, %v2368_v22 }
0x17c7   :  { %v2936_v32 = vmul.f32 -1.442695, %v2448_v31 }
0x17c9   :  { %3574 = vpow2.f32 %v2936_v32 }
0x17d6   :  { %v3575_v57 = vpop.eup %3574 }
0x17d7   :  { %v2452_v33 = vadd.f32 1.0, %v3575_v57 }
0x17d9   :  { %3576 = vrcp.f32 %v2452_v33  ;;  %v2678_v33 = vadd.f32 %v2365_v44, %v3960_v37 }
0x17e6   :  { %v3577_v34 = vpop.eup %3576 }
0x17e7   :  { %v2466_v21 = vsub.f32 1.0, %v3577_v34  ;;  %v2472_v39 = vmul.f32 %v3577_v34, %v2203_v23 }
0x1837   :  { %v2457_v35 = vpop.permute.xlu0 %2456 }
0x1838   :  { %v2459_v17 = vmul.f32 %v3577_v34, %v2457_v35 }
0x183a   :  { %2461 = vrot.lane.b32.xlu1 %v2459_v17, %s3695_s18 }
0x18ac   :  { %v2462_v45 = vpop.permute.xlu1 %2461 }
0x18ad   :  { %v2464_v38 = vadd.f32 %v2462_v45, %v2368_v22 }
0x18af   :  { %3578 = vtanh.f32 %v2464_v38 }
0x18bc   :  { %v3579_v26 = vpop.eup %3578 }
0x18bd   :  { %2468 = vrot.lane.b32.xlu0 %v3579_v26, %s3698_s4 }
0x192f   :  { %v2469_v36 = vpop.permute.xlu0 %2468 }
0x1930   :  { %v2471_v40 = vmul.f32 %v2469_v36, %v2466_v21 }
0x1932   :  { %v2473_v41 = vadd.f32 %v2472_v39, %v2471_v40  ;;  %v2808_v39 = vld [vmem:[#allocation7 + $0x340] sm:$0xff]  ;;  %v2807_v40 = vld [vmem:[#allocation7 + $0x338] sm:$0xff] }
0x1934   :  { %2476 = vrot.lane.b32.xlu1 %v2473_v41, %s3698_s4 }
0x19a6   :  { %v4165_v42 = vpop.permute.xlu1 %2476 }
0x19a7   :  { %3454 = vmatmul.mubr.msk.f32.vlgmr.msra.gmra.mxu1 %vm1397_vm7, %v4165_v42 }
0x19a8   :  { %3468 = vmatpush3.msra.mxu1 %v4115_v15  ;;  %3475 = vmatprep.mubr.msk.f32.mxu1 %vm3697_vm0, %v3696_v0  ;;  %v2576_v15 = vadd.f32 %v2363_v43, %v3960_v37  ;;  %v2806_v37 = vld [vmem:[#allocation7 + $0x330] sm:$0xff]  ;;  %v2804_v43 = vld [vmem:[#allocation7 + $0x320] sm:$0xff] }
0x19a9   :  { %3469 = vmatprep.subr.mxu1 %v3696_v0 }
0x19aa   :  { %3470 = vmatpush3.msra.mxu1 %v4117_v10 }
0x19ab   :  { %3471 = vmatprep.subr.mxu1 %v3696_v0 }
0x19ac   :  { %3472 = vmatpush3.msra.mxu1 %v4122_v7 }
0x19ad   :  { %3473 = vmatprep.subr.mxu1 %v3696_v0 }
0x19ae   :  { %3474 = vmatpush3.msra.mxu1 %v4128_v16 }
0x1a67   :  { %v2546_v46 = vpop.f32.mrf.mxu1 }
0x1a68   :  { %v2547_v48 = vadd.f32 %v2546_v46, %v4157_v13  ;;  %v2803_v46 = vld [vmem:[#allocation7 + $0x318] sm:$0xff] }
0x1a69   :  { %v3455_v49 = vpop.f32.mrf.mxu1 }
0x1a6a   :  { %2558 = vrot.lane.b32.xlu0 %v2547_v48, %s3695_s18  ;;  %v2550_v52 = vadd.f32 %v2547_v48, %v2474_v51  ;;  %v2802_v48 = vld [vmem:[#allocation7 + $0x310] sm:$0xff]  ;;  %v2801_v49 = vld [vmem:[#allocation7 + $0x308] sm:$0xff] }
0x1a6c   :  { %v2938_v2 = vmul.f32 -1.442695, %v2550_v52  ;;  %v2799_v52 = vld [vmem:[#allocation7 + $0x2f8] sm:$0xff] }
0x1a6e   :  { %3580 = vpow2.f32 %v2938_v2  ;;  %v2798_v2 = vld [vmem:[#allocation7 + $0x2f0] sm:$0xff] }
0x1a7b   :  { %v3581_v53 = vpop.eup %3580 }
0x1a7c   :  { %v2554_v54 = vadd.f32 1.0, %v3581_v53  ;;  %v2797_v53 = vld [vmem:[#allocation7 + $0x2e8] sm:$0xff] }
0x1a7e   :  { %3582 = vrcp.f32 %v2554_v54  ;;  %v2796_v54 = vld [vmem:[#allocation7 + $0x2e0] sm:$0xff] }
0x1a8b   :  { %v3583_v55 = vpop.eup %3582 }
0x1a8c   :  { %v2568_v61 = vsub.f32 1.0, %v3583_v55  ;;  %v2574_v63 = vmul.f32 %v3583_v55, %v2473_v41  ;;  %v2805_v41 = vld [vmem:[#allocation7 + $0x328] sm:$0xff] }
0x1adc   :  { %v2559_v56 = vpop.permute.xlu0 %2558 }
0x1add   :  { %v2561_v58 = vmul.f32 %v3583_v55, %v2559_v56  ;;  %v2795_v55 = vld [vmem:[#allocation7 + $0x2d8] sm:$0xff]  ;;  %v2794_v56 = vld [vmem:[#allocation7 + $0x2d0] sm:$0xff] }
0x1adf   :  { %2563 = vrot.lane.b32.xlu1 %v2561_v58, %s3695_s18  ;;  %v2793_v58 = vld [vmem:[#allocation7 + $0x2c8] sm:$0xff] }
0x1b51   :  { %v2564_v9 = vpop.permute.xlu1 %2563 }
0x1b52   :  { %v2566_v59 = vadd.f32 %v2564_v9, %v2474_v51  ;;  %v2800_v51 = vld [vmem:[#allocation7 + $0x300] sm:$0xff] }
0x1b54   :  { %3584 = vtanh.f32 %v2566_v59 }
0x1b61   :  { %v3585_v60 = vpop.eup %3584 }
0x1b62   :  { %2570 = vrot.lane.b32.xlu0 %v3585_v60, %s3698_s4 }
0x1bd4   :  { %v2571_v62 = vpop.permute.xlu0 %2570 }
0x1bd5   :  { %v2573_v1 = vmul.f32 %v2571_v62, %v2568_v61 }
0x1bd7   :  { %v4183_v3 = vadd.f32 %v2574_v63, %v2573_v1 }
0x1bd9   :  { %2578 = vrot.lane.b32.xlu1 %v4183_v3, %s3698_s4  ;;  %v2788_v1 = vsel %vm1397_vm7, %v4165_v42, %v4183_v3 }
0x1c4b   :  { %v2579_v47 = vpop.permute.xlu1 %2578 }
0x1c4c   :  { %3465 = vmatmul.mubr.msk.f32.vlgmr.msra.gmra.mxu0 %vm1397_vm7, %v2579_v47 }
0x1c4d   :  { %3510 = vmatprep.mubr.msk.f32.mxu0 %vm3697_vm0, %v3696_v0  ;;  %3479 = vmatpush3.msra.mxu0 %v2808_v39 }
0x1c4e   :  { %3480 = vmatprep.subr.mxu0 %v3696_v0 }
0x1c4f   :  { %3481 = vmatpush3.msra.mxu0 %v2807_v40 }
0x1c50   :  { %3482 = vmatprep.subr.mxu0 %v3696_v0 }
0x1c51   :  { %3483 = vmatpush3.msra.mxu0 %v2806_v37 }
0x1c52   :  { %3484 = vmatprep.subr.mxu0 %v3696_v0 }
0x1c53   :  { %3485 = vmatpush3.msra.mxu0 %v2805_v41 }
0x1c54   :  { %3486 = vmatprep.subr.mxu0 %v3696_v0 }
0x1c55   :  { %3487 = vmatpush3.msra.mxu0 %v2804_v43 }
0x1c56   :  { %3488 = vmatprep.subr.mxu0 %v3696_v0 }
0x1c57   :  { %3489 = vmatpush3.msra.mxu0 %v2803_v46 }
0x1c58   :  { %3490 = vmatprep.subr.mxu0 %v3696_v0 }
0x1c59   :  { %3491 = vmatpush3.msra.mxu0 %v2802_v48 }
0x1c5a   :  { %3492 = vmatprep.subr.mxu0 %v3696_v0 }
0x1c5b   :  { %3493 = vmatpush3.msra.mxu0 %v2801_v49 }
0x1c5c   :  { %3494 = vmatprep.subr.mxu0 %v3696_v0 }
0x1c5d   :  { %3495 = vmatpush3.msra.mxu0 %v2800_v51 }
0x1c5e   :  { %3496 = vmatprep.subr.mxu0 %v3696_v0 }
0x1c5f   :  { %3497 = vmatpush3.msra.mxu0 %v2799_v52 }
0x1c60   :  { %3498 = vmatprep.subr.mxu0 %v3696_v0 }
0x1c61   :  { %3499 = vmatpush3.msra.mxu0 %v2798_v2 }
0x1c62   :  { %3500 = vmatprep.subr.mxu0 %v3696_v0 }
0x1c63   :  { %3501 = vmatpush3.msra.mxu0 %v2797_v53 }
0x1c64   :  { %3502 = vmatprep.subr.mxu0 %v3696_v0 }
0x1c65   :  { %3503 = vmatpush3.msra.mxu0 %v2796_v54 }
0x1c66   :  { %3504 = vmatprep.subr.mxu0 %v3696_v0 }
0x1c67   :  { %3505 = vmatpush3.msra.mxu0 %v2795_v55 }
0x1c68   :  { %3506 = vmatprep.subr.mxu0 %v3696_v0 }
0x1c69   :  { %3507 = vmatpush3.msra.mxu0 %v2794_v56 }
0x1c6a   :  { %3508 = vmatprep.subr.mxu0 %v3696_v0 }
0x1c6b   :  { %3509 = vmatpush3.msra.mxu0 %v2793_v58 }
0x1d0c   :  { %v2648_v4 = vpop.f32.mrf.mxu0 }
0x1d0d   :  { %v2649_v5 = vadd.f32 %v2648_v4, %v4157_v13 }
0x1d0e   :  { %v3466_v6 = vpop.f32.mrf.mxu0 }
0x1d0f   :  { %2660 = vrot.lane.b32.xlu0 %v2649_v5, %s3695_s18  ;;  %v2652_v10 = vadd.f32 %v2649_v5, %v2576_v15  ;;  %v2812_v5 = vrot.slane %v4152_v28, %v1359_v50 }
0x1d11   :  { %v2940_v7 = vmul.f32 -1.442695, %v2652_v10 }
0x1d13   :  { %3586 = vpow2.f32 %v2940_v7 }
0x1d20   :  { %v3587_v16 = vpop.eup %3586 }
0x1d21   :  { %v2656_v11 = vadd.f32 1.0, %v3587_v16 }
0x1d23   :  { %3588 = vrcp.f32 %v2656_v11 }
0x1d30   :  { %v3589_v18 = vpop.eup %3588 }
0x1d31   :  { %v2670_v24 = vsub.f32 1.0, %v3589_v18  ;;  %v2676_v14 = vmul.f32 %v3589_v18, %v4183_v3 }
0x1d81   :  { %v2661_v19 = vpop.permute.xlu0 %2660 }
0x1d82   :  { %v2663_v8 = vmul.f32 %v3589_v18, %v2661_v19 }
0x1d84   :  { %2665 = vrot.lane.b32.xlu1 %v2663_v8, %s3695_s18 }
0x1df6   :  { %v2666_v20 = vpop.permute.xlu1 %2665 }
0x1df7   :  { %v2668_v23 = vadd.f32 %v2666_v20, %v2576_v15 }
0x1df9   :  { %3590 = vtanh.f32 %v2668_v23 }
0x1e06   :  { %v3591_v12 = vpop.eup %3590 }
0x1e07   :  { %2672 = vrot.lane.b32.xlu0 %v3591_v12, %s3698_s4 }
0x1e79   :  { %v2673_v29 = vpop.permute.xlu0 %2672 }
0x1e7a   :  { %v2675_v30 = vmul.f32 %v2673_v29, %v2670_v24 }
0x1e7c   :  { %v4196_v27 = vadd.f32 %v2676_v14, %v2675_v30 }
0x1e7e   :  { %2680 = vrot.lane.b32.xlu1 %v4196_v27, %s3698_s4 }
0x1ef0   :  { %v2681_v22 = vpop.permute.xlu1 %2680 }
0x1ef1   :  { %3476 = vmatmul.mubr.msk.f32.vlgmr.msra.gmra.mxu1 %vm1397_vm7, %v2681_v22 }
0x1fb1   :  { %v2750_v31 = vpop.f32.mrf.mxu1 }
0x1fb2   :  { %v2751_v32 = vadd.f32 %v2750_v31, %v4157_v13 }
0x1fb3   :  { %v3477_v57 = vpop.f32.mrf.mxu1 }
0x1fb4   :  { %2762 = vrot.lane.b32.xlu0 %v2751_v32, %s3695_s18  ;;  %v2754_v34 = vadd.f32 %v2751_v32, %v2678_v33 }
0x1fb6   :  { %v2942_v35 = vmul.f32 -1.442695, %v2754_v34 }
0x1fb8   :  { %3592 = vpow2.f32 %v2942_v35 }
0x1fc5   :  { %v3593_v17 = vpop.eup %3592 }
0x1fc6   :  { %v2758_v45 = vadd.f32 1.0, %v3593_v17 }
0x1fc8   :  { %3594 = vrcp.f32 %v2758_v45 }
0x1fd5   :  { %v3595_v38 = vpop.eup %3594 }
0x1fd6   :  { %v2772_v9 = vsub.f32 1.0, %v3595_v38  ;;  %v2778_v61 = vmul.f32 %v3595_v38, %v4196_v27 }
0x2026   :  { %v2763_v26 = vpop.permute.xlu0 %2762 }
0x2027   :  { %v2765_v21 = vmul.f32 %v3595_v38, %v2763_v26 }
0x2029   :  { %2767 = vrot.lane.b32.xlu1 %v2765_v21, %s3695_s18 }
0x202d   :  { %2781 = vrot.lane.b32.xlu1 %v4196_v27, %s3691_s13 }
0x209b   :  { %v2768_v13 = vpop.permute.xlu1 %2767 }
0x209c   :  { %v2770_v36 = vadd.f32 %v2768_v13, %v2678_v33 }
0x209e   :  { %3596 = vtanh.f32 %v2770_v36 }
0x209f   :  { %v2782_v63 = vpop.permute.xlu1 %2781 }
0x20a0   :  { %v2790_v47 = vsel %vm2789_vm10, %v2788_v1, %v2782_v63 }
0x20ab   :  { %v3597_v44 = vpop.eup %3596 }
0x20ac   :  { %2774 = vrot.lane.b32.xlu0 %v3597_v44, %s3698_s4 }
0x211e   :  { %v2775_v59 = vpop.permute.xlu0 %2774 }
0x211f   :  { %v2777_v60 = vmul.f32 %v2775_v59, %v2772_v9 }
0x2121   :  { %v2779_v62 = vadd.f32 %v2778_v61, %v2777_v60 }
0x2123   :  { %2785 = vrot.lane.b32.xlu0 %v2779_v62, %s3695_s18 }
0x2195   :  { %v2786_v4 = vpop.permute.xlu0 %2785 }
0x2196   :  { %v2792_v0 = vsel %vm2791_vm11, %v2790_v47, %v2786_v4 }
0x2197   :  { %3511 = vmatmul.mubr.f32.vlgmr.msra.gmra.mxu0 %v2792_v0 }
0x2257   :  { %v2879_v6 = vpop.f32.mrf.mxu0 }
0x2258   :  { %v2880_v15 = vadd.f32 %v2879_v6, %v2812_v5 }
0x2259   :  { %v3512_v10 = vpop.f32.mrf.mxu0 }
0x225a   :  { %2884 = vst.msk [vmem:[#allocation10] sm:$0x3] %vm2883_vm12, %v2880_v15 }
0x225b   :  { %3672 = shalt.err (!%p3669_p10)
}
0x225c   :  { %2894 = dma.vmem_to_hbm [thread:$0]  %s2892_s23, 32, %s4239_s5, [#allocation6]  }
0x225d   :  { %3685 = dma.done.wait [#allocation6], 32  }
0x225e   :  { %3686 = vsyncadd [#allocation6], 4294967264 }
0x225f   :  { %2898 = vsyncpa [#allocation5], 1 }
0x2260   :  { %2899 = vsyncpa [#allocation8], 1 }
0x2261   :  { %2900 = vsyncpa [#allocation6], 1 }

</bundles_post_ra>
